<compile_context>
chip_gen: v7x
topology: tpu7x:2x2x1
jax: 0.10.0
libtpu: 0.0.40
codegen_flags: <defaults>
</compile_context>

<pallas_src>
import functools

import jax
import jax.numpy as jnp
from jax.experimental import pallas as pl
from jax.experimental.pallas import tpu as pltpu

C_IN = 32
C_OUT = 16
KH = KW = 3
BN_EPS = 1e-5


def _fusion_kernel(x_ref, m_ref, bias_ref, ph_ref, v_ref, o_ref, *, B, H, W):
    """Process B images per grid step, fully lane-dense.

    x_ref:    (B*H, W*C_IN)             channels-last, lane-dense input rows
    m_ref:    (3, W*C_IN, W*C_OUT)      block-Toeplitz conv matrices (BN scale folded)
    bias_ref: (1, W*C_OUT)              folded conv+BN bias, tiled over W
    ph_ref:   (W*C_OUT, (W//2)*C_OUT)   horizontal 2->1 pooling matrix
    v_ref:    (B*H//2, B*H)             block-diagonal vertical pooling (x0.25 folded)
    o_ref:    (B*H//2, (W//2)*C_OUT)
    """
    BH = B * H
    x = x_ref[...]                                                    # (B*H, W*C_IN)

    # 3x3 conv: one MXU matmul per kernel row dy. dx taps + zero padding along W are
    # encoded in the banded structure of M[dy] — no layout copies.
    y0 = jnp.dot(x, m_ref[0], preferred_element_type=jnp.float32)     # kernel row 0
    y1 = jnp.dot(x, m_ref[1], preferred_element_type=jnp.float32)     # kernel row 1
    y2 = jnp.dot(x, m_ref[2], preferred_element_type=jnp.float32)     # kernel row 2

    # Combine the dy rows with sublane rolls (XLU) + per-image boundary masks.
    # out[h] = y0[h-1] + y1[h] + y2[h+1], with rows outside the image zeroed.
    row = jax.lax.broadcasted_iota(jnp.int32, (BH, W * C_OUT), 0) % H
    acc = y1
    acc = acc + jnp.where(row == 0, 0.0, pltpu.roll(y0, shift=1, axis=0))
    acc = acc + jnp.where(row == H - 1, 0.0, pltpu.roll(y2, shift=BH - 1, axis=0))

    # Folded bias (conv bias + BatchNorm) and ReLU.
    acc = jnp.maximum(acc + bias_ref[...], 0.0)

    # AvgPool2d(2,2): horizontal pair-sum via right matmul, vertical pair-sum (and
    # the 0.25 factor) via block-diagonal left matmul -> lane-dense pooled output.
    ph = jnp.dot(acc, ph_ref[...], preferred_element_type=jnp.float32)
    pooled = jnp.dot(v_ref[...], ph, preferred_element_type=jnp.float32)

    o_ref[...] = pooled.astype(o_ref.dtype)


def _build_conv_matrices(w_oihw, gamma, run_var, W):
    """Block-Toeplitz matrices M[dy] with the BN scale folded into the weights.

    M[dy, i*C_IN + cin, j*C_OUT + cout] = scale[cout] * w[cout, cin, dy, i-j+1]
    for |i - j| <= 1, else 0.  (i = input column, j = output column.)
    """
    inv_std = 1.0 / jnp.sqrt(run_var + BN_EPS)
    scale = gamma * inv_std                                        # (C_OUT,)
    w_hwio = jnp.transpose(w_oihw, (2, 3, 1, 0))                   # (3,3,C_IN,C_OUT)
    w_scaled = w_hwio * scale[None, None, None, :]

    i = jnp.arange(W)[:, None]
    j = jnp.arange(W)[None, :]
    d = i - j + 1                                                  # dx tap index
    valid = ((d >= 0) & (d <= 2)).astype(w_scaled.dtype)
    blocks = w_scaled[:, jnp.clip(d, 0, 2)]                        # (3, W, W, C_IN, C_OUT)
    blocks = blocks * valid[None, :, :, None, None]
    return blocks.transpose(0, 1, 3, 2, 4).reshape(3, W * C_IN, W * C_OUT)


def _build_pool_matrices(H, W, B, dtype):
    """Horizontal (right) and block-diagonal vertical (left, x0.25) pooling matrices."""
    eye_c = jnp.eye(C_OUT, dtype=dtype)
    hsel = (jnp.arange(W)[:, None] // 2 == jnp.arange(W // 2)[None, :]).astype(dtype)
    p_h = jnp.einsum("wx,cd->wcxd", hsel, eye_c).reshape(W * C_OUT, (W // 2) * C_OUT)

    vsel = (jnp.arange(H)[None, :] // 2 == jnp.arange(H // 2)[:, None]).astype(dtype)
    eye_b = jnp.eye(B, dtype=dtype)
    v = 0.25 * jnp.einsum("ab,hk->ahbk", eye_b, vsel).reshape(B * (H // 2), B * H)
    return p_h, v


def feature_fusion_pallas(x_nchw, w_oihw, conv_b, gamma, beta, run_mean, run_var,
                          *, block_b=None):
    """x_nchw: (N, 32, H, W) float32 -> (N, 16, H//2, W//2) float32."""
    N, Cin, H, W = x_nchw.shape
    assert Cin == C_IN and H % 2 == 0 and W % 2 == 0

    if block_b is None:
        # Batch >1 images per step to amortize per-step overhead, but keep >=2 grid
        # steps when possible so both v7x TensorCores receive work.
        block_b = 2 if (N % 2 == 0 and N >= 4) else 1
    assert N % block_b == 0
    B = block_b

    # NCHW -> channels-last, lane-dense (N*H, W*C_IN). The final reshape is free
    # (metadata only); only the transpose touches HBM (see TODO at top).
    x_dense = jnp.transpose(x_nchw, (0, 2, 3, 1)).reshape(N * H, W * C_IN)

    m = _build_conv_matrices(w_oihw, gamma, run_var, W).astype(jnp.float32)

    inv_std = 1.0 / jnp.sqrt(run_var + BN_EPS)
    bias = beta + gamma * inv_std * (conv_b - run_mean)            # (C_OUT,)
    bias_row = jnp.tile(bias, (W,)).reshape(1, W * C_OUT)

    p_h, v = _build_pool_matrices(H, W, B, jnp.float32)

    H2 = H // 2
    Wc2 = (W // 2) * C_OUT
    kernel = functools.partial(_fusion_kernel, B=B, H=H, W=W)

    out = pl.pallas_call(
        kernel,
        out_shape=jax.ShapeDtypeStruct((N * H2, Wc2), jnp.float32),
        grid_spec=pltpu.PrefetchScalarGridSpec(
            num_scalar_prefetch=0,
            grid=(N // B,),
            in_specs=[
                pl.BlockSpec((B * H, W * C_IN), lambda i: (i, 0)),       # input rows
                pl.BlockSpec((KH, W * C_IN, W * C_OUT), lambda i: (0, 0, 0)),  # M (resident)
                pl.BlockSpec((1, W * C_OUT), lambda i: (0, 0)),          # bias (resident)
                pl.BlockSpec((W * C_OUT, Wc2), lambda i: (0, 0)),        # P_h (resident)
                pl.BlockSpec((B * H2, B * H), lambda i: (0, 0)),         # V   (resident)
            ],
            out_specs=pl.BlockSpec((B * H2, Wc2), lambda i: (i, 0)),
        ),
        compiler_params=pltpu.CompilerParams(
            dimension_semantics=("parallel",),
        ),
    )(x_dense, m, bias_row, p_h, v)

    # (N*H/2, (W/2)*C_OUT) -> NCHW (N, C_OUT, H/2, W/2). Tiny output transpose.
    return jnp.transpose(out.reshape(N, H2, W // 2, C_OUT), (0, 3, 1, 2))


def feature_fusion_reference(x_nchw, w_oihw, conv_b, gamma, beta, run_mean, run_var):
    """Plain-JAX reference (mirrors the PyTorch forward, eval-mode BN)."""
    y = jax.lax.conv_general_dilated(
        x_nchw, w_oihw, window_strides=(1, 1), padding=((1, 1), (1, 1)),
        dimension_numbers=("NCHW", "OIHW", "NCHW"),
    )
    y = y + conv_b[None, :, None, None]
    inv_std = 1.0 / jnp.sqrt(run_var + BN_EPS)
    y = (y - run_mean[None, :, None, None]) * (gamma * inv_std)[None, :, None, None]
    y = y + beta[None, :, None, None]
    y = jnp.maximum(y, 0.0)
    n, c, h, w = y.shape
    y = y.reshape(n, c, h // 2, 2, w // 2, 2).mean(axis=(3, 5))
    return y


if __name__ == "__main__":
    key = jax.random.PRNGKey(0)
    k_x, k_w, k_b, k_g, k_be, k_m, k_v = jax.random.split(key, 7)

    N, H, W = 4, 16, 16
    x = jax.random.normal(k_x, (N, C_IN, H, W), jnp.float32)

    # Deterministic synthetic parameters (shapes per nn.Conv2d / nn.BatchNorm2d).
    w = jax.random.normal(k_w, (C_OUT, C_IN, KH, KW), jnp.float32) * 0.05
    conv_b = jax.random.normal(k_b, (C_OUT,), jnp.float32) * 0.05
    gamma = 1.0 + 0.1 * jax.random.normal(k_g, (C_OUT,), jnp.float32)
    beta = 0.1 * jax.random.normal(k_be, (C_OUT,), jnp.float32)
    run_mean = 0.1 * jax.random.normal(k_m, (C_OUT,), jnp.float32)
    run_var = jnp.abs(jax.random.normal(k_v, (C_OUT,), jnp.float32)) + 0.5

    out = feature_fusion_pallas(x, w, conv_b, gamma, beta, run_mean, run_var)
    out = jax.block_until_ready(out)

    ref = feature_fusion_reference(x, w, conv_b, gamma, beta, run_mean, run_var)
    assert out.shape == (N, C_OUT, H // 2, W // 2), out.shape
    max_err = float(jnp.max(jnp.abs(out - ref)))
    assert jnp.allclose(out, ref, atol=2e-4, rtol=2e-4), max_err

    print("KERNEL_OK")
</pallas_src>

<mosaic_0001>
module attributes {stable_mosaic.version = 11 : i64} {
  func.func @_fusion_kernel(%arg0: i32, %arg1: memref<32x512xf32, #tpu.memory_space<vmem>>, %arg2: memref<3x512x256xf32, #tpu.memory_space<vmem>>, %arg3: memref<1x256xf32, #tpu.memory_space<vmem>>, %arg4: memref<256x128xf32, #tpu.memory_space<vmem>>, %arg5: memref<16x32xf32, #tpu.memory_space<vmem>>, %arg6: memref<16x128xf32, #tpu.memory_space<vmem>>) attributes {dimension_semantics = [#tpu.dimension_semantics<parallel>], iteration_bounds = array<i64: 2>, scalar_prefetch = 0 : i64, scratch_operands = 0 : i64, tpu.core_type = #tpu.core_type<tc>, window_params = [{transform_indices = @transform_0, window_bounds = array<i64: 32, 512>}, {pipeline_mode = #tpu.pipeline_mode<synchronous>, transform_indices = @transform_1, window_bounds = array<i64: 3, 512, 256>}, {pipeline_mode = #tpu.pipeline_mode<synchronous>, transform_indices = @transform_2, window_bounds = array<i64: 1, 256>}, {pipeline_mode = #tpu.pipeline_mode<synchronous>, transform_indices = @transform_3, window_bounds = array<i64: 256, 128>}, {pipeline_mode = #tpu.pipeline_mode<synchronous>, transform_indices = @transform_4, window_bounds = array<i64: 16, 32>}, {transform_indices = @transform_5, window_bounds = array<i64: 16, 128>}]} {
    %c0 = arith.constant 0 : index
    %c0_0 = arith.constant 0 : index
    %0 = vector.load %arg1[%c0, %c0_0] : memref<32x512xf32, #tpu.memory_space<vmem>>, vector<32x512xf32>
    %c0_1 = arith.constant 0 : index
    %c0_2 = arith.constant 0 : index
    %c0_3 = arith.constant 0 : index
    %1 = vector.load %arg2[%c0_1, %c0_2, %c0_3] : memref<3x512x256xf32, #tpu.memory_space<vmem>>, vector<1x512x256xf32>
    %2 = vector.shape_cast %1 : vector<1x512x256xf32> to vector<512x256xf32>
    %cst = arith.constant dense<0.000000e+00> : vector<32x256xf32>
    %3 = tpu.matmul %0, %2, %cst {dimension_numbers = #tpu.dot_dimension_numbers<[1], [0], [0], [1], [0, 0, 1, 1], [], []>} : vector<32x512xf32>, vector<512x256xf32>, vector<32x256xf32> -> vector<32x256xf32>
    %c1 = arith.constant 1 : index
    %c0_4 = arith.constant 0 : index
    %c0_5 = arith.constant 0 : index
    %4 = vector.load %arg2[%c1, %c0_4, %c0_5] : memref<3x512x256xf32, #tpu.memory_space<vmem>>, vector<1x512x256xf32>
    %5 = vector.shape_cast %4 : vector<1x512x256xf32> to vector<512x256xf32>
    %cst_6 = arith.constant dense<0.000000e+00> : vector<32x256xf32>
    %6 = tpu.matmul %0, %5, %cst_6 {dimension_numbers = #tpu.dot_dimension_numbers<[1], [0], [0], [1], [0, 0, 1, 1], [], []>} : vector<32x512xf32>, vector<512x256xf32>, vector<32x256xf32> -> vector<32x256xf32>
    %c2 = arith.constant 2 : index
    %c0_7 = arith.constant 0 : index
    %c0_8 = arith.constant 0 : index
    %7 = vector.load %arg2[%c2, %c0_7, %c0_8] : memref<3x512x256xf32, #tpu.memory_space<vmem>>, vector<1x512x256xf32>
    %8 = vector.shape_cast %7 : vector<1x512x256xf32> to vector<512x256xf32>
    %cst_9 = arith.constant dense<0.000000e+00> : vector<32x256xf32>
    %9 = tpu.matmul %0, %8, %cst_9 {dimension_numbers = #tpu.dot_dimension_numbers<[1], [0], [0], [1], [0, 0, 1, 1], [], []>} : vector<32x512xf32>, vector<512x256xf32>, vector<32x256xf32> -> vector<32x256xf32>
    %10 = tpu.iota {dimensions = array<i32: 0>} : vector<32x256xi32>
    %c16_i32 = arith.constant 16 : i32
    %c0_i32 = arith.constant 0 : i32
    %11 = arith.cmpi eq, %c16_i32, %c0_i32 : i32
    %c1_i32 = arith.constant 1 : i32
    %12 = arith.select %11, %c1_i32, %c16_i32 : i32
    %13 = vector.broadcast %12 : i32 to vector<32x256xi32>
    %14 = arith.remsi %10, %13 : vector<32x256xi32>
    %c0_i32_10 = arith.constant 0 : i32
    %15 = vector.broadcast %c0_i32_10 : i32 to vector<32x256xi32>
    %16 = arith.cmpi ne, %14, %15 : vector<32x256xi32>
    %c0_i32_11 = arith.constant 0 : i32
    %17 = vector.broadcast %c0_i32_11 : i32 to vector<32x256xi32>
    %18 = arith.cmpi slt, %14, %17 : vector<32x256xi32>
    %c0_i32_12 = arith.constant 0 : i32
    %19 = arith.cmpi slt, %12, %c0_i32_12 : i32
    %20 = vector.broadcast %19 : i1 to vector<32x256xi1>
    %21 = vector.broadcast %20 : vector<32x256xi1> to vector<32x256xi1>
    %22 = arith.xori %18, %21 : vector<32x256xi1>
    %23 = arith.andi %22, %16 : vector<32x256xi1>
    %24 = vector.broadcast %12 : i32 to vector<32x256xi32>
    %25 = arith.addi %14, %24 : vector<32x256xi32>
    %26 = arith.select %23, %25, %14 : vector<32x256xi1>, vector<32x256xi32>
    %c0_i32_13 = arith.constant 0 : i32
    %27 = vector.broadcast %c0_i32_13 : i32 to vector<32x256xi32>
    %28 = arith.cmpi eq, %26, %27 : vector<32x256xi32>
    %c1_i32_14 = arith.constant 1 : i32
    %29 = tpu.dynamic_rotate %3 by %c1_i32_14 dim 0 : vector<32x256xf32>, i32 -> vector<32x256xf32>
    %cst_15 = arith.constant 0.000000e+00 : f32
    %30 = vector.broadcast %cst_15 : f32 to vector<32x256xf32>
    %31 = arith.select %28, %30, %29 : vector<32x256xi1>, vector<32x256xf32>
    %32 = arith.addf %6, %31 : vector<32x256xf32>
    %c15_i32 = arith.constant 15 : i32
    %33 = vector.broadcast %c15_i32 : i32 to vector<32x256xi32>
    %34 = arith.cmpi eq, %26, %33 : vector<32x256xi32>
    %c31_i32 = arith.constant 31 : i32
    %35 = tpu.dynamic_rotate %9 by %c31_i32 dim 0 : vector<32x256xf32>, i32 -> vector<32x256xf32>
    %cst_16 = arith.constant 0.000000e+00 : f32
    %36 = vector.broadcast %cst_16 : f32 to vector<32x256xf32>
    %37 = arith.select %34, %36, %35 : vector<32x256xi1>, vector<32x256xf32>
    %38 = arith.addf %32, %37 : vector<32x256xf32>
    %c0_17 = arith.constant 0 : index
    %c0_18 = arith.constant 0 : index
    %39 = vector.load %arg3[%c0_17, %c0_18] : memref<1x256xf32, #tpu.memory_space<vmem>>, vector<1x256xf32>
    %40 = vector.broadcast %39 : vector<1x256xf32> to vector<32x256xf32>
    %41 = arith.addf %38, %40 : vector<32x256xf32>
    %cst_19 = arith.constant 0.000000e+00 : f32
    %42 = vector.broadcast %cst_19 : f32 to vector<32x256xf32>
    %43 = arith.maximumf %41, %42 : vector<32x256xf32>
    %c0_20 = arith.constant 0 : index
    %c0_21 = arith.constant 0 : index
    %44 = vector.load %arg4[%c0_20, %c0_21] : memref<256x128xf32, #tpu.memory_space<vmem>>, vector<256x128xf32>
    %cst_22 = arith.constant dense<0.000000e+00> : vector<32x128xf32>
    %45 = tpu.matmul %43, %44, %cst_22 {dimension_numbers = #tpu.dot_dimension_numbers<[1], [0], [0], [1], [0, 0, 1, 1], [], []>} : vector<32x256xf32>, vector<256x128xf32>, vector<32x128xf32> -> vector<32x128xf32>
    %c0_23 = arith.constant 0 : index
    %c0_24 = arith.constant 0 : index
    %46 = vector.load %arg5[%c0_23, %c0_24] : memref<16x32xf32, #tpu.memory_space<vmem>>, vector<16x32xf32>
    %cst_25 = arith.constant dense<0.000000e+00> : vector<16x128xf32>
    %47 = tpu.matmul %46, %45, %cst_25 {dimension_numbers = #tpu.dot_dimension_numbers<[1], [0], [0], [1], [0, 0, 1, 1], [], []>} : vector<16x32xf32>, vector<32x128xf32>, vector<16x128xf32> -> vector<16x128xf32>
    %c0_26 = arith.constant 0 : index
    %c0_27 = arith.constant 0 : index
    %48 = vector.load %arg6[%c0_26, %c0_27] : memref<16x128xf32, #tpu.memory_space<vmem>>, vector<16x128xf32>
    tpu.vector_store %arg6[%c0_26, %c0_27], %47 {strides = array<i32>} : memref<16x128xf32, #tpu.memory_space<vmem>>, vector<16x128xf32>,
    return
  }
  func.func @transform_0(%arg0: i32) -> (i32, i32) {
    %c0_i32 = arith.constant 0 : i32
    %c0_i32_0 = arith.constant 0 : i32
    return %arg0, %c0_i32 : i32, i32
  }
  func.func @transform_1(%arg0: i32) -> (i32, i32, i32) {
    %c0_i32 = arith.constant 0 : i32
    %c0_i32_0 = arith.constant 0 : i32
    %c0_i32_1 = arith.constant 0 : i32
    %c0_i32_2 = arith.constant 0 : i32
    return %c0_i32, %c0_i32_0, %c0_i32_1 : i32, i32, i32
  }
  func.func @transform_2(%arg0: i32) -> (i32, i32) {
    %c0_i32 = arith.constant 0 : i32
    %c0_i32_0 = arith.constant 0 : i32
    %c0_i32_1 = arith.constant 0 : i32
    return %c0_i32, %c0_i32_0 : i32, i32
  }
  func.func @transform_3(%arg0: i32) -> (i32, i32) {
    %c0_i32 = arith.constant 0 : i32
    %c0_i32_0 = arith.constant 0 : i32
    %c0_i32_1 = arith.constant 0 : i32
    return %c0_i32, %c0_i32_0 : i32, i32
  }
  func.func @transform_4(%arg0: i32) -> (i32, i32) {
    %c0_i32 = arith.constant 0 : i32
    %c0_i32_0 = arith.constant 0 : i32
    %c0_i32_1 = arith.constant 0 : i32
    return %c0_i32, %c0_i32_0 : i32, i32
  }
  func.func @transform_5(%arg0: i32) -> (i32, i32) {
    %c0_i32 = arith.constant 0 : i32
    %c0_i32_0 = arith.constant 0 : i32
    return %arg0, %c0_i32 : i32, i32
  }
}

</mosaic_0001>

<bundles_post_ra>
// kernel: tpu_custom_call.1
= control target key start
LH: loop header
LB: loop body
LE: loop exit
PB: predicated region body
PF: predicated region fallthrough
CT: control target
= control target key end

     0   :  { %10 = vsyncpa [#allocation3], 0  ;;  %s3088_s0 = inlined_call_operand.hbm [shape: f32[64,512], index: 0, kind: input, shape index: {}]   ;;  %s3089_s1 = inlined_call_operand.hbm [shape: f32[3,512,256], index: 1, kind: input, shape index: {}]   ;;  %s3090_s2 = inlined_call_operand.hbm [shape: f32[1,256], index: 2, kind: input, shape index: {}]   ;;  %s3091_s3 = inlined_call_operand.hbm [shape: f32[256,128], index: 3, kind: input, shape index: {}]   ;;  %s3092_s4 = inlined_call_operand.hbm [shape: f32[16,32], index: 4, kind: input, shape index: {}]   ;;  %s3093_s5 = inlined_call_operand.hbm [shape: f32[32,128], index: 5, kind: output, shape index: {}]  }
   0x1   :  { %12 = vsyncpa [#allocation3 + $0x1], 0 }
   0x2   :  { %13 = vsyncpa [#allocation6], 0 }
   0x3   :  { %14 = vsyncpa [#allocation9], 0 }
   0x4   :  { %15 = vsyncpa [#allocation4], 0 }
   0x5   :  { %17 = vsyncpa [#allocation4 + $0x1], 0  ;;  %s2638_s18 = smov 0   ;;  %s2640_s19 = smov 0  }
   0x6   :  { %s2642_s20 = smov 0   ;;  %s2644_s21 = smov 0  }
   0x7 LB: > { %s2659_s22 = sadd.s32 4294967295, %s2592_s21   ;;  %s1713_s23 = sadd.s32 4294967294, %s2592_s21   ;;  %s2592_s21 = sphi %s2644_s21, %s3122_s21   ;;  %s2588_s20 = sphi %s2642_s20, %s3121_s20   ;;  %s2584_s19 = sphi %s2640_s19, %s3120_s19   ;;  %s2580_s18 = sphi %s2638_s18, %s3119_s18  }
   0x8   : > { %p43_p0 = scmp.ne.s32.totalorder %s2584_s19, %s2580_s18  ;;  %p3094_p1 = scmp.eq.s32.totalorder %s2659_s22, 0 }
   0x9   : > { %p157_p3 = scmp.eq.s32.totalorder %s1713_s23, 1  ;;  %p1714_p5 = scmp.ge.s32.totalorder %s2592_s21, 1 }
   0xa   : > { %p2668_p4 = por %p3094_p1, %p43_p0  ;;  %p164_p7 = scmp.lt.s32.totalorder %s2592_s21, 3 }
   0xb   : > { %p2673_p6 = por %p157_p3, %p43_p0  ;;  %s2594_s27 = smov [#allocation5]  }
   0xc   : > { %s3097_s24 = scalar_select %p2668_p4, 1, 0 }
   0xd   : > { %s3098_s25 = scalar_select %p2673_p6, 1, 0 }
   0xe   : > { %p2678_p8 = pnand %p1714_p5, %p164_p7  ;;  %s176_s28 = sshll.u32 %s2594_s27, 4  ;;  %s2682_s28 = int_to_ptr.vmem [resolvable:$true] %s176_s28 }
   0xf   : > { %s2595_s30 = smov [#allocation8]   ;;  %s2376_s9 = scalar_lea.hbm %s3089_s1, 49152 }
  0x10   : > { %s3099_s26 = scalar_select %p2678_p8, 1, 0 }
  0x11   : > { %p2294_p9 = pneg %p2678_p8  ;;  %s200_s6 = sshll.u32 %s2595_s30, 4  ;;  %s2693_s6 = int_to_ptr.vmem [resolvable:$true] %s200_s6 }
  0x12   : > { %p2377_p12 = scmp.ne.s32.totalorder %s3089_s1, %s2376_s9  ;;  %p2383_p5 = scmp.lt.u32.totalorder %s2376_s9, %s3089_s1 }
  0x13   : > { %p2689_p11 = pnand %p2294_p9, %p3094_p1 }
  0x15   : > { %p2703_p13 = pneg %p2689_p11 }
  0x17   : > { %p2379_p0 = pnand %p2703_p13, %p2377_p12 }
  0x19   : > { %p2380_p3 = pneg %p2379_p0 }
  0x1b   : > { %p2385_p7 = pnand %p2383_p5, %p2380_p3 }
  0x1d   : > { %2388 = shalt.err (!%p2385_p7)
}
  0x1e   : > { %s2389_s15 = scalar_lea.vmem %s2682_s28, 49152  ;;  %p2397_p2 = scmp.lt.s32.totalorder %s2682_s28, %s2682_s28 }
  0x1f   : > { %p2390_p9 = scmp.ne.s32.totalorder %s2682_s28, %s2389_s15  ;;  %p2398_p6 = scmp.lt.s32.totalorder %s2389_s15, %s2389_s15 }
  0x21   : > { %p2392_p10 = pnand %p2390_p9, %p2703_p13  ;;  %p2399_p12 = por %p2398_p6, %p2397_p2 }
  0x23   : > { %p2393_p1 = pneg %p2392_p10 }
  0x25   : > { %p2400_p0 = pnand %p2399_p12, %p2393_p1 }
  0x27   : > { %2403 = shalt.err (!%p2400_p0)
}
  0x28   : > { %s2596_s16 = smov 256   ;;  %s2597_s17 = smov 16  }
  0x29   : > { %2297 = dma.hbm_to_vmem [thread:$0]  (!%p2689_p11), %s3089_s1, 49152, %s2682_s28, [#allocation6], %s2596_s16, %s2596_s16, %s2597_s17  }
  0x2a   : > { %s2404_s8 = scalar_lea.hbm %s3091_s3, 4096 }
  0x2b   : > { %p2405_p2 = scmp.ne.s32.totalorder %s3091_s3, %s2404_s8  ;;  %p2411_p10 = scmp.lt.u32.totalorder %s2404_s8, %s3091_s3 }
  0x2d   : > { %p2407_p1 = pnand %p2405_p2, %p2703_p13 }
  0x2f   : > { %p2408_p6 = pneg %p2407_p1 }
  0x31   : > { %p2413_p3 = pnand %p2411_p10, %p2408_p6 }
  0x33   : > { %2416 = shalt.err (!%p2413_p3)
}
  0x34   : > { %s2417_s28 = scalar_lea.vmem %s2693_s6, 4096  ;;  %p2425_p12 = scmp.lt.s32.totalorder %s2693_s6, %s2693_s6 }
  0x35   : > { %p2418_p5 = scmp.ne.s32.totalorder %s2693_s6, %s2417_s28  ;;  %p2426_p0 = scmp.lt.s32.totalorder %s2417_s28, %s2417_s28 }
  0x37   : > { %p2420_p7 = pnand %p2418_p5, %p2703_p13  ;;  %p2427_p2 = por %p2426_p0, %p2425_p12 }
  0x39   : > { %p2421_p9 = pneg %p2420_p7 }
  0x3b   : > { %p2428_p1 = pnand %p2427_p2, %p2421_p9 }
  0x3d   : > { %2431 = shalt.err (!%p2428_p1)
}
  0x3e   : > { %s2598_s14 = smov 128   ;;  %s2599_s15 = smov 8  }
  0x3f   : > { %2303 = dma.hbm_to_vmem [thread:$0]  (!%p2689_p11), %s3091_s3, 4096, %s2693_s6, [#allocation9], %s2598_s14, %s2598_s14, %s2599_s15  }
  0x40   : > { %s2600_s23 = smov [#allocation7]   ;;  %s2601_s30 = smov [#allocation10]  }
  0x41   : > { %s190_s27 = sshll.u32 %s2600_s23, 4  ;;  %s213_s7 = sshll.u32 %s2601_s30, 4  ;;  %s191_s27 = int_to_ptr.vmem [resolvable:$true] %s190_s27  ;;  %s2750_s7 = int_to_ptr.vmem [resolvable:$true] %s213_s7 }
  0x42   : > { %s2432_s10 = scalar_lea.hbm %s3090_s2, 32 }
  0x43   : > { %p2433_p6 = scmp.ne.s32.totalorder %s3090_s2, %s2432_s10  ;;  %p2439_p5 = scmp.lt.u32.totalorder %s2432_s10, %s3090_s2 }
  0x45   : > { %p2435_p10 = pnand %p2433_p6, %p2703_p13 }
  0x47   : > { %p2436_p3 = pneg %p2435_p10 }
  0x49   : > { %p2441_p7 = pnand %p2439_p5, %p2436_p3 }
  0x4b   : > { %2444 = shalt.err (!%p2441_p7)
}
  0x4c   : > { %s2445_s16 = scalar_lea.vmem %s191_s27, 32  ;;  %p2453_p2 = scmp.lt.s32.totalorder %s191_s27, %s191_s27 }
  0x4d   : > { %p2446_p9 = scmp.ne.s32.totalorder %s191_s27, %s2445_s16  ;;  %p2454_p1 = scmp.lt.s32.totalorder %s2445_s16, %s2445_s16 }
  0x4f   : > { %p2448_p12 = pnand %p2446_p9, %p2703_p13  ;;  %p2455_p4 = por %p2454_p1, %p2453_p2 }
  0x51   : > { %p2449_p0 = pneg %p2448_p12 }
  0x53   : > { %p2456_p8 = pnand %p2455_p4, %p2449_p0 }
  0x55   : > { %2459 = shalt.err (!%p2456_p8)
}
  0x56   : > { %2300 = dma.hbm_to_vmem [thread:$0]  (!%p2689_p11), %s3090_s2, 32, %s191_s27, [#allocation6]  }
  0x57   : > { %s2460_s9 = scalar_lea.hbm %s3092_s4, 256 }
  0x58   : > { %p2461_p6 = scmp.ne.s32.totalorder %s3092_s4, %s2460_s9  ;;  %p2467_p4 = scmp.lt.u32.totalorder %s2460_s9, %s3092_s4 }
  0x5a   : > { %p2463_p10 = pnand %p2461_p6, %p2703_p13 }
  0x5c   : > { %p2464_p3 = pneg %p2463_p10 }
  0x5e   : > { %p2469_p8 = pnand %p2467_p4, %p2464_p3 }
  0x60   : > { %2472 = shalt.err (!%p2469_p8)
}
  0x61   : > { %s2473_s27 = scalar_lea.vmem %s2750_s7, 256  ;;  %p2481_p12 = scmp.lt.s32.totalorder %s2750_s7, %s2750_s7 }
  0x62   : > { %p2474_p5 = scmp.ne.s32.totalorder %s2750_s7, %s2473_s27  ;;  %p2482_p0 = scmp.lt.s32.totalorder %s2473_s27, %s2473_s27 }
  0x64   : > { %p2476_p7 = pnand %p2474_p5, %p2703_p13  ;;  %p2483_p2 = por %p2482_p0, %p2481_p12 }
  0x66   : > { %p2477_p9 = pneg %p2476_p7 }
  0x68   : > { %p2484_p1 = pnand %p2483_p2, %p2477_p9 }
  0x6a   : > { %2487 = shalt.err (!%p2484_p1)
}
  0x6b   : > { %2306 = dma.hbm_to_vmem [thread:$0]  (!%p2689_p11), %s3092_s4, 256, %s2750_s7, [#allocation9], %s2598_s14, %s2598_s14, %s2599_s15  }
  0x6c   : > { %s2797_s29 = sadd.s32 1, %s2592_s21   ;;  %s30_s17 = sadd.s32 1, %s2588_s20 }
  0x6d   : > { %s27_s12 = ssub.s32 %s2592_s21, %s2797_s29  ;;  %p37_p6 = scmp.ne.s32.totalorder %s2588_s20, %s2584_s19 }
  0x6e   : > { %p28_p13 = scmp.eq.s32.totalorder %s27_s12, 0  ;;  %p38_p10 = scmp.eq.s32.totalorder %s2592_s21, 0 }
  0x6f   : > { %p3102_p4 = scmp.eq.s32.totalorder %s2659_s22, 1  ;;  %p2319_p5 = scmp.lt.s32.totalorder %s2592_s21, 2 }
  0x70   : > { %s2806_s23 = scalar_select %p28_p13, %s2588_s20, %s30_s17  }
  0x71   : > { %p39_p3 = por %p38_p10, %p37_p6  ;;  %p2810_p8 = por %p3102_p4, %p37_p6 }
  0x72   : > { %s227_s8 = sand.u32 1, %s2588_s20   ;;  %s1739_s14 = sshll.u32 %s2592_s21, 11 }
  0x73   : > { %s1720_s9 = sshll.u32 %s227_s8, 7  ;;  %s2820_s10 = scalar_lea.hbm %s3088_s0, %s1739_s14 }
  0x74   : > { %s231_s11 = scalar_lea.vmem [#allocation2], %s1720_s9  ;;  %p2824_p11 = pnand %p2319_p5, %p39_p3 }
  0x75   : > { %s239_s13 = sshll.u32 %s231_s11, 4  ;;  %s2828_s27 = scalar_lea.sflag [#allocation3], %s227_s8  ;;  %s2822_s13 = int_to_ptr.vmem [resolvable:$true] %s239_s13 }
  0x76   : > { %s2488_s6 = scalar_lea.hbm %s2820_s10, 2048  ;;  %p2490_p9 = pneg %p2824_p11 }
  0x77   : > { %p2489_p7 = scmp.ne.s32.totalorder %s2820_s10, %s2488_s6  ;;  %s2493_s17 = scalar_lea.hbm %s3088_s0, 4096 }
  0x78   : > { %p2494_p2 = scmp.lt.u32.totalorder %s2820_s10, %s3088_s0  ;;  %p2495_p1 = scmp.lt.u32.totalorder %s2493_s17, %s2488_s6 }
  0x79   : > { %p2491_p12 = pnand %p2490_p9, %p2489_p7  ;;  %p2497_p6 = scmp.lt.u32.totalorder %s2488_s6, %s2820_s10 }
  0x7a   : > { %p2496_p13 = por %p2495_p1, %p2494_p2 }
  0x7b   : > { %p2492_p0 = pneg %p2491_p12 }
  0x7c   : > { %p2498_p10 = por %p2497_p6, %p2496_p13 }
  0x7e   : > { %p2499_p3 = pnand %p2498_p10, %p2492_p0 }
  0x80   : > { %2502 = shalt.err (!%p2499_p3)
}
  0x81   : > { %s2503_s8 = scalar_lea.vmem %s2822_s13, 2048  ;;  %s2602_s15 = smov [#allocation2]  }
  0x82   : > { %p2504_p4 = scmp.ne.s32.totalorder %s2822_s13, %s2503_s8  ;;  %s2508_s7 = sshll.u32 %s2602_s15, 4  ;;  %s2509_s7 = int_to_ptr.vmem [resolvable:$false] %s2508_s7 }
  0x83   : > { %s2510_s11 = scalar_lea.vmem %s2509_s7, 4096  ;;  %p2511_p12 = scmp.lt.s32.totalorder %s2822_s13, %s2509_s7 }
  0x84   : > { %p2506_p5 = pnand %p2504_p4, %p2490_p9  ;;  %p2512_p2 = scmp.lt.s32.totalorder %s2510_s11, %s2503_s8 }
  0x86   : > { %p2507_p7 = pneg %p2506_p5  ;;  %p2513_p1 = por %p2512_p2, %p2511_p12 }
  0x88   : > { %p2514_p13 = pnand %p2513_p1, %p2507_p7 }
  0x8a   : > { %2517 = shalt.err (!%p2514_p13)
}
  0x8b   : > { %s2603_s6 = smov 512   ;;  %s2604_s16 = smov 32  }
  0x8c   : > { %2310 = dma.hbm_to_vmem [thread:$0]  (!%p2824_p11), %s2820_s10, 2048, %s2822_s13, %s2828_s27, %s2603_s6, %s2603_s6, %s2604_s16  }
  0x8d   : > { %p3105_p9 = scmp.ne.s32.totalorder %s3099_s26, 0 }
  0x8e   : > { %s2859_s12 = sand.u32 (!%p3105_p9), 1, %s2584_s19   ;;  %p3106_p0 = scmp.ne.s32.totalorder (!%p3105_p9), %s3097_s24, 0 }
  0x8f   : > { %251 = sbr.rel (%p3105_p9) target bundleno = 1042 (0x412), region = 40  ;;  %s1725_s17 = sshll.u32 (!%p3105_p9), %s2859_s12, 7 }
  0x90   : > { %s254_s9 = scalar_lea.sflag (!%p3105_p9), [#allocation3], %s2859_s12  ;;  %s2863_s14 = scalar_lea.vmem (!%p3105_p9), [#allocation2], %s1725_s17 }
  0x96   : > { %2563 = dma.done.wait (%p3106_p0), %s254_s9, 2048  }
  0x97   : > { %2565 = vsyncadd (%p3106_p0), %s254_s9, 4294965248  ;;  %p3107_p11 = scmp.eq.s32.totalorder %s2659_s22, 0 }
  0x99   : > { %2567 = dma.done.wait (%p3107_p11), [#allocation6], 49184   ;;  %p3108_p6 = pmov %p3107_p11 }
  0x9b   : > { %2569 = vsyncadd (%p3108_p6), [#allocation6], 4294918112  ;;  %p3109_p10 = pmov %p3108_p6 }
  0x9c   : > { %p3110_p3 = pmov %p3108_p6 }
  0x9d   : > { %2571 = dma.done.wait (%p3109_p10), [#allocation9], 4352  }
  0x9e   : > { %2573 = vsyncadd (%p3110_p3), [#allocation9], 4294962944  ;;  %v319_v0 = vld [vmem:[#allocation5 + $0x8] sm:$0xff]  ;;  %v321_v1 = vld [vmem:[#allocation5 + $0x18] sm:$0xff]  ;;  %vm1504_vm6 = vcmask 261120   ;;  %s1730_s24 = sshll.u32 %s2859_s12, 4 }
  0x9f   : > { %v383_v2 = vld [vmem:[#allocation5 + $0x208] sm:$0xff]  ;;  %v1802_v3 = vpack.c.bf16 %v321_v1, %v319_v0  ;;  %v385_v4 = vld [vmem:[#allocation5 + $0x218] sm:$0xff]  ;;  %v318_v5 = vld [vmem:[#allocation5] sm:$0xff]  ;;  %s299_s26 = scalar_lea.vmem [#allocation11], %s1730_s24  ;;  %s1740_s13 = sshll.u32 %s2659_s22, 8 }
  0xa0   : > { %v320_v6 = vld [vmem:[#allocation5 + $0x10] sm:$0xff]  ;;  %v1866_v7 = vpack.c.bf16 %v385_v4, %v383_v2  ;;  %v382_v9 = vld [vmem:[#allocation5 + $0x200] sm:$0xff]  ;;  %v323_v11 = vld [vmem:[#allocation5 + $0x28] sm:$0xff]  ;;  %s1602_s10 = sshll.u32 %s299_s26, 4  ;;  %s3044_s8 = scalar_lea.hbm %s3093_s5, %s1740_s13  ;;  %s3039_s10 = int_to_ptr.vmem [resolvable:$true] %s1602_s10 }
  0xa1   : > { %v1804_v8 = vpack.c.bf16 %v320_v6, %v318_v5  ;;  %v384_v10 = vld [vmem:[#allocation5 + $0x210] sm:$0xff]  ;;  %1803 = vmatprep.subr.bf16.mxu1 %v1802_v3  ;;  %v325_v13 = vld [vmem:[#allocation5 + $0x38] sm:$0xff]  ;;  %v387_v14 = vld [vmem:[#allocation5 + $0x228] sm:$0xff]  ;;  %s1589_s15 = scalar_lea.sflag [#allocation4], %s2859_s12  ;;  %s2518_s7 = scalar_lea.vmem %s3039_s10, 256 }
  0xa2   : > { %v1868_v12 = vpack.c.bf16 %v384_v10, %v382_v9  ;;  %v389_v15 = vld [vmem:[#allocation5 + $0x238] sm:$0xff]  ;;  %1867 = vmatprep.subr.bf16.mxu0 %v1866_v7  ;;  %v1806_v16 = vpack.c.bf16 %v325_v13, %v323_v11  ;;  %v322_v18 = vld [vmem:[#allocation5 + $0x20] sm:$0xff]  ;;  %v324_v19 = vld [vmem:[#allocation5 + $0x30] sm:$0xff]  ;;  %p2519_p4 = scmp.ne.s32.totalorder %s3039_s10, %s2518_s7  ;;  %s2605_s22 = smov [#allocation11]  }
  0xa3   : > { %1805 = vmatpush1.bf16.msra.mxu1 %v1804_v8  ;;  %v1870_v17 = vpack.c.bf16 %v389_v15, %v387_v14  ;;  %v386_v20 = vld [vmem:[#allocation5 + $0x220] sm:$0xff]  ;;  %v1808_v21 = vpack.c.bf16 %v324_v19, %v322_v18  ;;  %v388_v22 = vld [vmem:[#allocation5 + $0x230] sm:$0xff]  ;;  %v327_v23 = vld [vmem:[#allocation5 + $0x48] sm:$0xff]  ;;  %s2522_s11 = sshll.u32 %s2605_s22, 4  ;;  %s2523_s11 = int_to_ptr.vmem [resolvable:$false] %s2522_s11 }
  0xa4   : > { %1869 = vmatpush1.bf16.msra.mxu0 %v1868_v12  ;;  %v329_v24 = vld [vmem:[#allocation5 + $0x58] sm:$0xff]  ;;  %1807 = vmatprep.subr.bf16.mxu1 %v1806_v16  ;;  %v1872_v25 = vpack.c.bf16 %v388_v22, %v386_v20  ;;  %v391_v27 = vld [vmem:[#allocation5 + $0x248] sm:$0xff]  ;;  %v326_v29 = vld [vmem:[#allocation5 + $0x40] sm:$0xff]  ;;  %p2520_p5 = pnand %p2519_p4, %p2810_p8  ;;  %s2524_s6 = scalar_lea.vmem %s2523_s11, 512 }
  0xa5   : > { %1871 = vmatprep.subr.bf16.mxu0 %v1870_v17  ;;  %v1810_v26 = vpack.c.bf16 %v329_v24, %v327_v23  ;;  %v393_v28 = vld [vmem:[#allocation5 + $0x258] sm:$0xff]  ;;  %v328_v31 = vld [vmem:[#allocation5 + $0x50] sm:$0xff]  ;;  %v390_v32 = vld [vmem:[#allocation5 + $0x240] sm:$0xff]  ;;  %p2525_p12 = scmp.lt.s32.totalorder %s3039_s10, %s2523_s11  ;;  %p2526_p2 = scmp.lt.s32.totalorder %s2524_s6, %s2518_s7 }
  0xa6   : > { %v1874_v30 = vpack.c.bf16 %v393_v28, %v391_v27  ;;  %v392_v33 = vld [vmem:[#allocation5 + $0x250] sm:$0xff]  ;;  %v1812_v34 = vpack.c.bf16 %v328_v31, %v326_v29  ;;  %v331_v35 = vld [vmem:[#allocation5 + $0x68] sm:$0xff]  ;;  %v333_v36 = vld [vmem:[#allocation5 + $0x78] sm:$0xff]  ;;  %p2521_p7 = pneg %p2520_p5 }
  0xa7   : > { %1809 = vmatpush1.bf16.msra.mxu1 %v1808_v21  ;;  %v395_v37 = vld [vmem:[#allocation5 + $0x268] sm:$0xff]  ;;  %v1876_v38 = vpack.c.bf16 %v392_v33, %v390_v32  ;;  %v1814_v39 = vpack.c.bf16 %v333_v36, %v331_v35  ;;  %v397_v40 = vld [vmem:[#allocation5 + $0x278] sm:$0xff]  ;;  %v330_v41 = vld [vmem:[#allocation5 + $0x60] sm:$0xff]  ;;  %p2527_p1 = por %p2526_p2, %p2525_p12 }
  0xa8   : > { %1873 = vmatpush1.bf16.msra.mxu0 %v1872_v25  ;;  %1811 = vmatprep.subr.bf16.mxu1 %v1810_v26  ;;  %v332_v42 = vld [vmem:[#allocation5 + $0x70] sm:$0xff]  ;;  %v1878_v43 = vpack.c.bf16 %v397_v40, %v395_v37  ;;  %v394_v44 = vld [vmem:[#allocation5 + $0x260] sm:$0xff]  ;;  %v335_v46 = vld [vmem:[#allocation5 + $0x88] sm:$0xff] }
  0xa9   : > { %1875 = vmatprep.subr.bf16.mxu0 %v1874_v30  ;;  %v396_v45 = vld [vmem:[#allocation5 + $0x270] sm:$0xff]  ;;  %v337_v47 = vld [vmem:[#allocation5 + $0x98] sm:$0xff]  ;;  %v399_v48 = vld [vmem:[#allocation5 + $0x288] sm:$0xff]  ;;  %v1816_v50 = vpack.c.bf16 %v332_v42, %v330_v41  ;;  %p2528_p13 = pnand %p2527_p1, %p2521_p7 }
  0xaa   : > { %v401_v49 = vld [vmem:[#allocation5 + $0x298] sm:$0xff]  ;;  %v1880_v51 = vpack.c.bf16 %v396_v45, %v394_v44  ;;  %v1818_v52 = vpack.c.bf16 %v337_v47, %v335_v46  ;;  %v334_v53 = vld [vmem:[#allocation5 + $0x80] sm:$0xff]  ;;  %v336_v54 = vld [vmem:[#allocation5 + $0x90] sm:$0xff] }
  0xab   : > { %1813 = vmatpush1.bf16.msra.mxu1 %v1812_v34  ;;  %v398_v55 = vld [vmem:[#allocation5 + $0x280] sm:$0xff]  ;;  %v1882_v56 = vpack.c.bf16 %v401_v49, %v399_v48  ;;  %v400_v57 = vld [vmem:[#allocation5 + $0x290] sm:$0xff]  ;;  %v339_v58 = vld [vmem:[#allocation5 + $0xa8] sm:$0xff]  ;;  %v1820_v62 = vpack.c.bf16 %v336_v54, %v334_v53 }
  0xac   : > { %1877 = vmatpush1.bf16.msra.mxu0 %v1876_v38  ;;  %1815 = vmatprep.subr.bf16.mxu1 %v1814_v39  ;;  %v341_v59 = vld [vmem:[#allocation5 + $0xb8] sm:$0xff]  ;;  %v403_v60 = vld [vmem:[#allocation5 + $0x2a8] sm:$0xff]  ;;  %v1884_v63 = vpack.c.bf16 %v400_v57, %v398_v55  ;;  %v338_v1 = vld [vmem:[#allocation5 + $0xa0] sm:$0xff] }
  0xad   : > { %1879 = vmatprep.subr.bf16.mxu0 %v1878_v43  ;;  %v405_v61 = vld [vmem:[#allocation5 + $0x2b8] sm:$0xff]  ;;  %v1822_v0 = vpack.c.bf16 %v341_v59, %v339_v58  ;;  %v340_v2 = vld [vmem:[#allocation5 + $0xb0] sm:$0xff]  ;;  %v402_v3 = vld [vmem:[#allocation5 + $0x2a0] sm:$0xff] }
  0xae   : > { %v1886_v4 = vpack.c.bf16 %v405_v61, %v403_v60  ;;  %v404_v5 = vld [vmem:[#allocation5 + $0x2b0] sm:$0xff]  ;;  %v343_v6 = vld [vmem:[#allocation5 + $0xc8] sm:$0xff]  ;;  %v345_v7 = vld [vmem:[#allocation5 + $0xd8] sm:$0xff]  ;;  %v1824_v10 = vpack.c.bf16 %v340_v2, %v338_v1 }
  0xaf   : > { %1817 = vmatpush1.bf16.msra.mxu1 %v1816_v50  ;;  %v407_v8 = vld [vmem:[#allocation5 + $0x2c8] sm:$0xff]  ;;  %v409_v9 = vld [vmem:[#allocation5 + $0x2d8] sm:$0xff]  ;;  %v1888_v11 = vpack.c.bf16 %v404_v5, %v402_v3  ;;  %v1826_v12 = vpack.c.bf16 %v345_v7, %v343_v6  ;;  %v342_v13 = vld [vmem:[#allocation5 + $0xc0] sm:$0xff] }
  0xb0   : > { %1881 = vmatpush1.bf16.msra.mxu0 %v1880_v51  ;;  %1819 = vmatprep.subr.bf16.mxu1 %v1818_v52  ;;  %v344_v14 = vld [vmem:[#allocation5 + $0xd0] sm:$0xff]  ;;  %v406_v15 = vld [vmem:[#allocation5 + $0x2c0] sm:$0xff]  ;;  %v1890_v16 = vpack.c.bf16 %v409_v9, %v407_v8  ;;  %v347_v18 = vld [vmem:[#allocation5 + $0xe8] sm:$0xff] }
  0xb1   : > { %1883 = vmatprep.subr.bf16.mxu0 %v1882_v56  ;;  %v408_v17 = vld [vmem:[#allocation5 + $0x2d0] sm:$0xff]  ;;  %v349_v19 = vld [vmem:[#allocation5 + $0xf8] sm:$0xff]  ;;  %v411_v20 = vld [vmem:[#allocation5 + $0x2e8] sm:$0xff]  ;;  %v1828_v22 = vpack.c.bf16 %v344_v14, %v342_v13 }
  0xb2   : > { %v413_v21 = vld [vmem:[#allocation5 + $0x2f8] sm:$0xff]  ;;  %v1892_v23 = vpack.c.bf16 %v408_v17, %v406_v15  ;;  %v1830_v24 = vpack.c.bf16 %v349_v19, %v347_v18  ;;  %v346_v25 = vld [vmem:[#allocation5 + $0xe0] sm:$0xff]  ;;  %v348_v26 = vld [vmem:[#allocation5 + $0xf0] sm:$0xff] }
  0xb3   : > { %1821 = vmatpush1.bf16.msra.mxu1 %v1820_v62  ;;  %v410_v27 = vld [vmem:[#allocation5 + $0x2e0] sm:$0xff]  ;;  %v1894_v28 = vpack.c.bf16 %v413_v21, %v411_v20  ;;  %v412_v29 = vld [vmem:[#allocation5 + $0x2f0] sm:$0xff]  ;;  %v351_v30 = vld [vmem:[#allocation5 + $0x108] sm:$0xff]  ;;  %v1832_v34 = vpack.c.bf16 %v348_v26, %v346_v25 }
  0xb4   : > { %1885 = vmatpush1.bf16.msra.mxu0 %v1884_v63  ;;  %1823 = vmatprep.subr.bf16.mxu1 %v1822_v0  ;;  %v353_v31 = vld [vmem:[#allocation5 + $0x118] sm:$0xff]  ;;  %v415_v32 = vld [vmem:[#allocation5 + $0x308] sm:$0xff]  ;;  %v1896_v35 = vpack.c.bf16 %v412_v29, %v410_v27  ;;  %v350_v37 = vld [vmem:[#allocation5 + $0x100] sm:$0xff] }
  0xb5   : > { %1887 = vmatprep.subr.bf16.mxu0 %v1886_v4  ;;  %v417_v33 = vld [vmem:[#allocation5 + $0x318] sm:$0xff]  ;;  %v1834_v36 = vpack.c.bf16 %v353_v31, %v351_v30  ;;  %v352_v38 = vld [vmem:[#allocation5 + $0x110] sm:$0xff]  ;;  %v414_v39 = vld [vmem:[#allocation5 + $0x300] sm:$0xff] }
  0xb6   : > { %v1898_v40 = vpack.c.bf16 %v417_v33, %v415_v32  ;;  %v416_v41 = vld [vmem:[#allocation5 + $0x310] sm:$0xff]  ;;  %v355_v42 = vld [vmem:[#allocation5 + $0x128] sm:$0xff]  ;;  %v357_v43 = vld [vmem:[#allocation5 + $0x138] sm:$0xff]  ;;  %v1836_v46 = vpack.c.bf16 %v352_v38, %v350_v37 }
  0xb7   : > { %1825 = vmatpush1.bf16.msra.mxu1 %v1824_v10  ;;  %v419_v44 = vld [vmem:[#allocation5 + $0x328] sm:$0xff]  ;;  %v421_v45 = vld [vmem:[#allocation5 + $0x338] sm:$0xff]  ;;  %v1900_v47 = vpack.c.bf16 %v416_v41, %v414_v39  ;;  %v1838_v48 = vpack.c.bf16 %v357_v43, %v355_v42  ;;  %v354_v49 = vld [vmem:[#allocation5 + $0x120] sm:$0xff] }
  0xb8   : > { %1889 = vmatpush1.bf16.msra.mxu0 %v1888_v11  ;;  %1827 = vmatprep.subr.bf16.mxu1 %v1826_v12  ;;  %v356_v50 = vld [vmem:[#allocation5 + $0x130] sm:$0xff]  ;;  %v418_v51 = vld [vmem:[#allocation5 + $0x320] sm:$0xff]  ;;  %v1902_v52 = vpack.c.bf16 %v421_v45, %v419_v44  ;;  %v359_v54 = vld [vmem:[#allocation5 + $0x148] sm:$0xff] }
  0xb9   : > { %1891 = vmatprep.subr.bf16.mxu0 %v1890_v16  ;;  %v420_v53 = vld [vmem:[#allocation5 + $0x330] sm:$0xff]  ;;  %v361_v55 = vld [vmem:[#allocation5 + $0x158] sm:$0xff]  ;;  %v423_v56 = vld [vmem:[#allocation5 + $0x348] sm:$0xff]  ;;  %v1840_v58 = vpack.c.bf16 %v356_v50, %v354_v49 }
  0xba   : > { %v425_v57 = vld [vmem:[#allocation5 + $0x358] sm:$0xff]  ;;  %v1904_v59 = vpack.c.bf16 %v420_v53, %v418_v51  ;;  %v1842_v60 = vpack.c.bf16 %v361_v55, %v359_v54  ;;  %v358_v61 = vld [vmem:[#allocation5 + $0x140] sm:$0xff]  ;;  %v360_v62 = vld [vmem:[#allocation5 + $0x150] sm:$0xff] }
  0xbb   : > { %1829 = vmatpush1.bf16.msra.mxu1 %v1828_v22  ;;  %v422_v63 = vld [vmem:[#allocation5 + $0x340] sm:$0xff]  ;;  %v1906_v0 = vpack.c.bf16 %v425_v57, %v423_v56  ;;  %v424_v1 = vld [vmem:[#allocation5 + $0x350] sm:$0xff]  ;;  %v363_v2 = vld [vmem:[#allocation5 + $0x168] sm:$0xff]  ;;  %v1844_v6 = vpack.c.bf16 %v360_v62, %v358_v61 }
  0xbc   : > { %1893 = vmatpush1.bf16.msra.mxu0 %v1892_v23  ;;  %1831 = vmatprep.subr.bf16.mxu1 %v1830_v24  ;;  %v365_v3 = vld [vmem:[#allocation5 + $0x178] sm:$0xff]  ;;  %v427_v4 = vld [vmem:[#allocation5 + $0x368] sm:$0xff]  ;;  %v362_v7 = vld [vmem:[#allocation5 + $0x160] sm:$0xff]  ;;  %v1908_v8 = vpack.c.bf16 %v424_v1, %v422_v63 }
  0xbd   : > { %1895 = vmatprep.subr.bf16.mxu0 %v1894_v28  ;;  %v429_v5 = vld [vmem:[#allocation5 + $0x378] sm:$0xff]  ;;  %v1846_v9 = vpack.c.bf16 %v365_v3, %v363_v2  ;;  %v364_v10 = vld [vmem:[#allocation5 + $0x170] sm:$0xff]  ;;  %v426_v11 = vld [vmem:[#allocation5 + $0x360] sm:$0xff] }
  0xbe   : > { %v428_v12 = vld [vmem:[#allocation5 + $0x370] sm:$0xff]  ;;  %v1910_v13 = vpack.c.bf16 %v429_v5, %v427_v4  ;;  %v367_v14 = vld [vmem:[#allocation5 + $0x188] sm:$0xff]  ;;  %v369_v15 = vld [vmem:[#allocation5 + $0x198] sm:$0xff]  ;;  %v1848_v20 = vpack.c.bf16 %v364_v10, %v362_v7 }
  0xbf   : > { %1833 = vmatpush1.bf16.msra.mxu1 %v1832_v34  ;;  %v2878_v16 = vld [vmem:[%s2863_s14 + $0x8] sm:$0xff]  ;;  %v433_v18 = vld [vmem:[#allocation5 + $0x398] sm:$0xff]  ;;  %v1912_v21 = vpack.c.bf16 %v428_v12, %v426_v11  ;;  %v1850_v22 = vpack.c.bf16 %v369_v15, %v367_v14  ;;  %v366_v23 = vld [vmem:[#allocation5 + $0x180] sm:$0xff] }
  0xc0   : > { %1897 = vmatpush1.bf16.msra.mxu0 %v1896_v35  ;;  %1835 = vmatprep.subr.bf16.mxu1 %v1834_v36  ;;  %v431_v17 = vld [vmem:[#allocation5 + $0x388] sm:$0xff]  ;;  %v2882_v19 = vld [vmem:[%s2863_s14 + $0x18] sm:$0xff]  ;;  %v368_v24 = vld [vmem:[#allocation5 + $0x190] sm:$0xff] }
  0xc1   : > { %1899 = vmatprep.subr.bf16.mxu0 %v1898_v40  ;;  %510 = vmatprep.mubr.f32.mxu1 %v2878_v16  ;;  %v430_v25 = vld [vmem:[#allocation5 + $0x380] sm:$0xff]  ;;  %v1914_v26 = vpack.c.bf16 %v433_v18, %v431_v17  ;;  %v432_v27 = vld [vmem:[#allocation5 + $0x390] sm:$0xff]  ;;  %v371_v28 = vld [vmem:[#allocation5 + $0x1a8] sm:$0xff]  ;;  %v1852_v32 = vpack.c.bf16 %v368_v24, %v366_v23 }
  0xc2   : > { %599 = vmatprep.mubr.f32.mxu0 %v2882_v19  ;;  %v373_v29 = vld [vmem:[#allocation5 + $0x1b8] sm:$0xff]  ;;  %v435_v30 = vld [vmem:[#allocation5 + $0x3a8] sm:$0xff]  ;;  %v1916_v33 = vpack.c.bf16 %v432_v27, %v430_v25  ;;  %v370_v35 = vld [vmem:[#allocation5 + $0x1a0] sm:$0xff] }
  0xc3   : > { %1837 = vmatpush1.bf16.msra.mxu1 %v1836_v46  ;;  %v437_v31 = vld [vmem:[#allocation5 + $0x3b8] sm:$0xff]  ;;  %v1854_v34 = vpack.c.bf16 %v373_v29, %v371_v28  ;;  %v372_v36 = vld [vmem:[#allocation5 + $0x1b0] sm:$0xff]  ;;  %v434_v37 = vld [vmem:[#allocation5 + $0x3a0] sm:$0xff] }
  0xc4   : > { %1901 = vmatpush1.bf16.msra.mxu0 %v1900_v47  ;;  %1839 = vmatprep.subr.bf16.mxu1 %v1838_v48  ;;  %v1918_v38 = vpack.c.bf16 %v437_v31, %v435_v30  ;;  %v436_v39 = vld [vmem:[#allocation5 + $0x3b0] sm:$0xff]  ;;  %v375_v40 = vld [vmem:[#allocation5 + $0x1c8] sm:$0xff]  ;;  %v377_v41 = vld [vmem:[#allocation5 + $0x1d8] sm:$0xff]  ;;  %v1856_v44 = vpack.c.bf16 %v372_v36, %v370_v35 }
  0xc5   : > { %1903 = vmatprep.subr.bf16.mxu0 %v1902_v52  ;;  %v439_v42 = vld [vmem:[#allocation5 + $0x3c8] sm:$0xff]  ;;  %v441_v43 = vld [vmem:[#allocation5 + $0x3d8] sm:$0xff]  ;;  %v1920_v45 = vpack.c.bf16 %v436_v39, %v434_v37  ;;  %v1858_v46 = vpack.c.bf16 %v377_v41, %v375_v40  ;;  %v374_v47 = vld [vmem:[#allocation5 + $0x1c0] sm:$0xff] }
  0xc6   : > { %v376_v48 = vld [vmem:[#allocation5 + $0x1d0] sm:$0xff]  ;;  %v438_v49 = vld [vmem:[#allocation5 + $0x3c0] sm:$0xff]  ;;  %v1922_v50 = vpack.c.bf16 %v441_v43, %v439_v42  ;;  %v379_v52 = vld [vmem:[#allocation5 + $0x1e8] sm:$0xff] }
  0xc7   : > { %1841 = vmatpush1.bf16.msra.mxu1 %v1840_v58  ;;  %v440_v51 = vld [vmem:[#allocation5 + $0x3d0] sm:$0xff]  ;;  %v381_v53 = vld [vmem:[#allocation5 + $0x1f8] sm:$0xff]  ;;  %v443_v54 = vld [vmem:[#allocation5 + $0x3e8] sm:$0xff]  ;;  %v1860_v56 = vpack.c.bf16 %v376_v48, %v374_v47 }
  0xc8   : > { %1905 = vmatpush1.bf16.msra.mxu0 %v1904_v59  ;;  %1843 = vmatprep.subr.bf16.mxu1 %v1842_v60  ;;  %v445_v55 = vld [vmem:[#allocation5 + $0x3f8] sm:$0xff]  ;;  %v1924_v57 = vpack.c.bf16 %v440_v51, %v438_v49  ;;  %v1862_v58 = vpack.c.bf16 %v381_v53, %v379_v52  ;;  %v378_v59 = vld [vmem:[#allocation5 + $0x1e0] sm:$0xff]  ;;  %v380_v60 = vld [vmem:[#allocation5 + $0x1f0] sm:$0xff] }
  0xc9   : > { %1907 = vmatprep.subr.bf16.mxu0 %v1906_v0  ;;  %v442_v61 = vld [vmem:[#allocation5 + $0x3e0] sm:$0xff]  ;;  %v1926_v62 = vpack.c.bf16 %v445_v55, %v443_v54  ;;  %v444_v63 = vld [vmem:[#allocation5 + $0x3f0] sm:$0xff]  ;;  %v755_v0 = vld [vmem:[#allocation5 + $0x808] sm:$0xff]  ;;  %v1864_v4 = vpack.c.bf16 %v380_v60, %v378_v59 }
  0xca   : > { %v757_v1 = vld [vmem:[#allocation5 + $0x818] sm:$0xff]  ;;  %v626_v2 = vld [vmem:[#allocation5 + $0x408] sm:$0xff]  ;;  %v1928_v5 = vpack.c.bf16 %v444_v63, %v442_v61  ;;  %v754_v7 = vld [vmem:[#allocation5 + $0x800] sm:$0xff] }
  0xcb   : > { %1845 = vmatpush1.bf16.msra.mxu1 %v1844_v6  ;;  %v628_v3 = vld [vmem:[#allocation5 + $0x418] sm:$0xff]  ;;  %v1930_v6 = vpack.c.bf16 %v757_v1, %v755_v0  ;;  %v625_v11 = vld [vmem:[#allocation5 + $0x400] sm:$0xff]  ;;  %v627_v12 = vld [vmem:[#allocation5 + $0x410] sm:$0xff] }
  0xcc   : > { %1909 = vmatpush1.bf16.msra.mxu0 %v1908_v8  ;;  %1847 = vmatprep.subr.bf16.mxu1 %v1846_v9  ;;  %v756_v8 = vld [vmem:[#allocation5 + $0x810] sm:$0xff]  ;;  %v2886_v9 = vld [vmem:[%s2863_s14] sm:$0xff]  ;;  %v2058_v10 = vpack.c.bf16 %v628_v3, %v626_v2  ;;  %v759_v14 = vld [vmem:[#allocation5 + $0x828] sm:$0xff] }
  0xcd   : > { %1911 = vmatprep.subr.bf16.mxu0 %v1910_v13  ;;  %v304_v13 = vld [vmem:[%s2863_s14 + $0x10] sm:$0xff]  ;;  %v761_v15 = vld [vmem:[#allocation5 + $0x838] sm:$0xff]  ;;  %v1932_v17 = vpack.c.bf16 %v756_v8, %v754_v7  ;;  %v2890_v18 = vld [vmem:[%s2863_s14 + $0x28] sm:$0xff] }
  0xce   : > { %v309_v23 = vld [vmem:[%s2863_s14 + $0x38] sm:$0xff]  ;;  %v758_v24 = vld [vmem:[#allocation5 + $0x820] sm:$0xff]  ;;  %v760_v25 = vld [vmem:[#allocation5 + $0x830] sm:$0xff]  ;;  %v1934_v27 = vpack.c.bf16 %v761_v15, %v759_v14 }
  0xcf   : > { %1849 = vmatpush1.bf16.msra.mxu1 %v1848_v20  ;;  %v630_v20 = vld [vmem:[#allocation5 + $0x428] sm:$0xff]  ;;  %v629_v28 = vld [vmem:[#allocation5 + $0x420] sm:$0xff]  ;;  %v631_v29 = vld [vmem:[#allocation5 + $0x430] sm:$0xff] }
  0xd0   : > { %1913 = vmatpush1.bf16.msra.mxu0 %v1912_v21  ;;  %1851 = vmatprep.subr.bf16.mxu1 %v1850_v22  ;;  %v632_v21 = vld [vmem:[#allocation5 + $0x438] sm:$0xff]  ;;  %v2060_v22 = vpack.c.bf16 %v627_v12, %v625_v11  ;;  %v308_v30 = vld [vmem:[%s2863_s14 + $0x30] sm:$0xff]  ;;  %v2899_v35 = vld [vmem:[%s2863_s14 + $0x48] sm:$0xff] }
  0xd1   : > { %1915 = vmatprep.subr.bf16.mxu0 %v1914_v26  ;;  %v2894_v26 = vld [vmem:[%s2863_s14 + $0x20] sm:$0xff]  ;;  %v2062_v31 = vpack.c.bf16 %v632_v21, %v630_v20  ;;  %v634_v36 = vld [vmem:[#allocation5 + $0x448] sm:$0xff]  ;;  %v636_v37 = vld [vmem:[#allocation5 + $0x458] sm:$0xff] }
  0xd2   : > { %v313_v39 = vld [vmem:[%s2863_s14 + $0x58] sm:$0xff]  ;;  %v762_v40 = vld [vmem:[#allocation5 + $0x840] sm:$0xff]  ;;  %v764_v41 = vld [vmem:[#allocation5 + $0x850] sm:$0xff]  ;;  %v2066_v47 = vpack.c.bf16 %v636_v37, %v634_v36 }
  0xd3   : > { %1853 = vmatpush1.bf16.msra.mxu1 %v1852_v32  ;;  %v763_v32 = vld [vmem:[#allocation5 + $0x848] sm:$0xff]  ;;  %v2904_v42 = vld [vmem:[%s2863_s14 + $0x40] sm:$0xff]  ;;  %v769_v49 = vld [vmem:[#allocation5 + $0x878] sm:$0xff] }
  0xd4   : > { %1917 = vmatpush1.bf16.msra.mxu0 %v1916_v33  ;;  %1855 = vmatprep.subr.bf16.mxu1 %v1854_v34  ;;  %v765_v33 = vld [vmem:[#allocation5 + $0x858] sm:$0xff]  ;;  %v1936_v34 = vpack.c.bf16 %v760_v25, %v758_v24  ;;  %v767_v48 = vld [vmem:[#allocation5 + $0x868] sm:$0xff]  ;;  %v766_v55 = vld [vmem:[#allocation5 + $0x860] sm:$0xff] }
  0xd5   : > { %1919 = vmatprep.subr.bf16.mxu0 %v1918_v38  ;;  %v2064_v38 = vpack.c.bf16 %v631_v29, %v629_v28  ;;  %v1938_v43 = vpack.c.bf16 %v765_v33, %v763_v32  ;;  %v2909_v51 = vld [vmem:[%s2863_s14 + $0x68] sm:$0xff]  ;;  %v640_v53 = vld [vmem:[#allocation5 + $0x478] sm:$0xff]  ;;  %v639_v59 = vld [vmem:[#allocation5 + $0x470] sm:$0xff] }
  0xd6   : > { %v638_v52 = vld [vmem:[#allocation5 + $0x468] sm:$0xff]  ;;  %v773_v61 = vld [vmem:[#allocation5 + $0x898] sm:$0xff]  ;;  %v2915_v2 = vld [vmem:[%s2863_s14 + $0x60] sm:$0xff] }
  0xd7   : > { %1857 = vmatpush1.bf16.msra.mxu1 %v1856_v44  ;;  %v633_v44 = vld [vmem:[#allocation5 + $0x440] sm:$0xff]  ;;  %v771_v60 = vld [vmem:[#allocation5 + $0x888] sm:$0xff]  ;;  %v2070_v63 = vpack.c.bf16 %v640_v53, %v638_v52  ;;  %v644_v1 = vld [vmem:[#allocation5 + $0x498] sm:$0xff] }
  0xd8   : > { %1921 = vmatpush1.bf16.msra.mxu0 %v1920_v45  ;;  %1859 = vmatprep.subr.bf16.mxu1 %v1858_v46  ;;  %v635_v45 = vld [vmem:[#allocation5 + $0x450] sm:$0xff]  ;;  %v642_v0 = vld [vmem:[#allocation5 + $0x488] sm:$0xff]  ;;  %v770_v7 = vld [vmem:[#allocation5 + $0x880] sm:$0xff] }
  0xd9   : > { %1923 = vmatprep.subr.bf16.mxu0 %v1922_v50  ;;  %v312_v46 = vld [vmem:[%s2863_s14 + $0x50] sm:$0xff]  ;;  %v1940_v50 = vpack.c.bf16 %v764_v41, %v762_v40  ;;  %v2068_v54 = vpack.c.bf16 %v635_v45, %v633_v44  ;;  %v2074_v11 = vpack.c.bf16 %v644_v1, %v642_v0  ;;  %v777_v14 = vld [vmem:[#allocation5 + $0x8b8] sm:$0xff]  ;;  %v646_v15 = vld [vmem:[#allocation5 + $0x4a8] sm:$0xff] }
  0xda   : > { %v316_v3 = vld [vmem:[%s2863_s14 + $0x70] sm:$0xff]  ;;  %v645_v25 = vld [vmem:[#allocation5 + $0x4a0] sm:$0xff]  ;;  %v779_v29 = vld [vmem:[#allocation5 + $0x8c8] sm:$0xff] }
  0xdb   : > { %1861 = vmatpush1.bf16.msra.mxu1 %v1860_v56  ;;  %v768_v56 = vld [vmem:[#allocation5 + $0x870] sm:$0xff]  ;;  %v652_v32 = vld [vmem:[#allocation5 + $0x4d8] sm:$0xff]  ;;  %v778_v37 = vld [vmem:[#allocation5 + $0x8c0] sm:$0xff] }
  0xdc   : > { %1925 = vmatpush1.bf16.msra.mxu0 %v1924_v57  ;;  %1863 = vmatprep.subr.bf16.mxu1 %v1862_v58  ;;  %v637_v57 = vld [vmem:[#allocation5 + $0x460] sm:$0xff]  ;;  %v1942_v58 = vpack.c.bf16 %v769_v49, %v767_v48  ;;  %v772_v8 = vld [vmem:[#allocation5 + $0x890] sm:$0xff]  ;;  %v785_v44 = vld [vmem:[#allocation5 + $0x8f8] sm:$0xff] }
  0xdd   : > { %1927 = vmatprep.subr.bf16.mxu0 %v1926_v62  ;;  %v317_v62 = vld [vmem:[%s2863_s14 + $0x78] sm:$0xff]  ;;  %v643_v12 = vld [vmem:[#allocation5 + $0x490] sm:$0xff]  ;;  %v1948_v20 = vpack.c.bf16 %v772_v8, %v770_v7  ;;  %v654_v45 = vld [vmem:[#allocation5 + $0x4e8] sm:$0xff] }
  0xde   : > { %v776_v24 = vld [vmem:[#allocation5 + $0x8b0] sm:$0xff]  ;;  %v782_v49 = vld [vmem:[#allocation5 + $0x8e0] sm:$0xff]  ;;  %v664_v7 = vld [vmem:[#allocation5 + $0x538] sm:$0xff] }
  0xdf   : > { %1865 = vmatpush1.bf16.msra.mxu1 %v1864_v4  ;;  %v1944_v4 = vpack.c.bf16 %v768_v56, %v766_v55  ;;  %v647_v28 = vld [vmem:[#allocation5 + $0x4b0] sm:$0xff]  ;;  %v653_v52 = vld [vmem:[#allocation5 + $0x4e0] sm:$0xff]  ;;  %v787_v55 = vld [vmem:[#allocation5 + $0x908] sm:$0xff] }
  0xe0   : > { %1929 = vmatpush1.bf16.msra.mxu0 %v1928_v5  ;;  %1931 = vmatprep.subr.bf16.mxu1 %v1930_v6  ;;  %v2072_v5 = vpack.c.bf16 %v639_v59, %v637_v57  ;;  %v1946_v6 = vpack.c.bf16 %v773_v61, %v771_v60  ;;  %v651_v41 = vld [vmem:[#allocation5 + $0x4d0] sm:$0xff]  ;;  %v789_v56 = vld [vmem:[#allocation5 + $0x918] sm:$0xff]  ;;  %v658_v57 = vld [vmem:[#allocation5 + $0x508] sm:$0xff] }
  0xe1   : > { %2059 = vmatprep.subr.bf16.mxu0 %v2058_v10  ;;  %v641_v10 = vld [vmem:[#allocation5 + $0x480] sm:$0xff]  ;;  %v1962_v61 = vpack.c.bf16 %v789_v56, %v787_v55  ;;  %v804_v55 = vld [vmem:[#allocation5 + $0x990] sm:$0xff] }
  0xe2   : > { %511 = vmatmul.mubr.f32.vlgmr.msra.gmra.mrb[0].mxu1 %v2886_v9  ;;  %v2076_v21 = vpack.c.bf16 %v643_v12, %v641_v10  ;;  %v657_v0 = vld [vmem:[#allocation5 + $0x500] sm:$0xff] }
  0xe3   : > { %600 = vmatmul.mubr.f32.vlgmr.msra.gmra.mrb[0].mxu0 %v304_v13  ;;  %1933 = vmatpush1.bf16.msra.mxu1 %v1932_v17  ;;  %v775_v13 = vld [vmem:[#allocation5 + $0x8a8] sm:$0xff]  ;;  %v648_v17 = vld [vmem:[#allocation5 + $0x4b8] sm:$0xff]  ;;  %v790_v12 = vld [vmem:[#allocation5 + $0x920] sm:$0xff] }
  0xe4   : > { %2061 = vmatpush1.bf16.msra.mxu0 %v2060_v22  ;;  %516 = vmatprep.mubr.f32.mxu1 %v2890_v18  ;;  %v1950_v22 = vpack.c.bf16 %v777_v14, %v775_v13  ;;  %v792_v13 = vld [vmem:[#allocation5 + $0x930] sm:$0xff]  ;;  %v661_v14 = vld [vmem:[#allocation5 + $0x520] sm:$0xff] }
  0xe5   : > { %605 = vmatprep.mubr.f32.mxu0 %v309_v23  ;;  %1935 = vmatprep.subr.bf16.mxu1 %v1934_v27  ;;  %v774_v23 = vld [vmem:[#allocation5 + $0x8a0] sm:$0xff]  ;;  %v2078_v27 = vpack.c.bf16 %v648_v17, %v646_v15  ;;  %v663_v17 = vld [vmem:[#allocation5 + $0x530] sm:$0xff] }
  0xe6   : > { %517 = vmatmul.mubr.f32.gmra.mrb[2].mxu1 %v2894_v26  ;;  %2063 = vmatprep.subr.bf16.mxu0 %v2062_v31  ;;  %v650_v31 = vld [vmem:[#allocation5 + $0x4c8] sm:$0xff]  ;;  %v1952_v33 = vpack.c.bf16 %v776_v24, %v774_v23  ;;  %v668_v23 = vld [vmem:[#allocation5 + $0x558] sm:$0xff]  ;;  %v1968_v24 = vpack.c.bf16 %v792_v13, %v790_v12  ;;  %v673_v56 = vld [vmem:[#allocation5 + $0x580] sm:$0xff] }
  0xe7   : > { %606 = vmatmul.mubr.f32.gmra.mrb[2].mxu0 %v308_v30  ;;  %1937 = vmatpush1.bf16.msra.mxu1 %v1936_v34  ;;  %v781_v30 = vld [vmem:[#allocation5 + $0x8d8] sm:$0xff]  ;;  %v2080_v34 = vpack.c.bf16 %v647_v28, %v645_v25  ;;  %v2082_v40 = vpack.c.bf16 %v652_v32, %v650_v31  ;;  %v2096_v25 = vpack.c.bf16 %v663_v17, %v661_v14  ;;  %v794_v28 = vld [vmem:[#allocation5 + $0x940] sm:$0xff]  ;;  %v667_v32 = vld [vmem:[#allocation5 + $0x550] sm:$0xff] }
  0xe8   : > { %2065 = vmatpush1.bf16.msra.mxu0 %v2064_v38  ;;  %522 = vmatprep.mubr.f32.mxu1 %v2899_v35  ;;  %v1954_v36 = vpack.c.bf16 %v781_v30, %v779_v29  ;;  %v780_v38 = vld [vmem:[#allocation5 + $0x8d0] sm:$0xff]  ;;  %v665_v30 = vld [vmem:[#allocation5 + $0x540] sm:$0xff]  ;;  %v684_v12 = vld [vmem:[#allocation5 + $0x5d8] sm:$0xff] }
  0xe9   : > { %611 = vmatprep.mubr.f32.mxu0 %v313_v39  ;;  %1939 = vmatprep.subr.bf16.mxu1 %v1938_v43  ;;  %v649_v39 = vld [vmem:[#allocation5 + $0x4c0] sm:$0xff]  ;;  %v783_v43 = vld [vmem:[#allocation5 + $0x8e8] sm:$0xff]  ;;  %v796_v29 = vld [vmem:[#allocation5 + $0x950] sm:$0xff] }
  0xea   : > { %523 = vmatmul.mubr.f32.gmra.mrb[4].mxu1 %v2904_v42  ;;  %2067 = vmatprep.subr.bf16.mxu0 %v2066_v47  ;;  %v1956_v47 = vpack.c.bf16 %v780_v38, %v778_v37  ;;  %v1958_v48 = vpack.c.bf16 %v785_v44, %v783_v43  ;;  %v672_v37 = vld [vmem:[#allocation5 + $0x578] sm:$0xff]  ;;  %v1972_v38 = vpack.c.bf16 %v796_v29, %v794_v28  ;;  %v800_v43 = vld [vmem:[#allocation5 + $0x970] sm:$0xff]  ;;  %v669_v44 = vld [vmem:[#allocation5 + $0x560] sm:$0xff] }
  0xeb   : > { %612 = vmatmul.mubr.f32.gmra.mrb[4].mxu0 %v312_v46  ;;  %1941 = vmatpush1.bf16.msra.mxu1 %v1940_v50  ;;  %v656_v46 = vld [vmem:[#allocation5 + $0x4f8] sm:$0xff]  ;;  %v784_v50 = vld [vmem:[#allocation5 + $0x8f0] sm:$0xff]  ;;  %v810_v17 = vld [vmem:[#allocation5 + $0x9c0] sm:$0xff] }
  0xec   : > { %2069 = vmatpush1.bf16.msra.mxu0 %v2068_v54  ;;  %528 = vmatprep.mubr.f32.mxu1 %v2909_v51  ;;  %v2086_v53 = vpack.c.bf16 %v656_v46, %v654_v45  ;;  %v655_v54 = vld [vmem:[#allocation5 + $0x4f0] sm:$0xff]  ;;  %v1960_v59 = vpack.c.bf16 %v784_v50, %v782_v49  ;;  %v676_v49 = vld [vmem:[#allocation5 + $0x598] sm:$0xff] }
  0xed   : > { %617 = vmatprep.mubr.f32.mxu0 %v317_v62  ;;  %1943 = vmatprep.subr.bf16.mxu1 %v1942_v58  ;;  %v660_v58 = vld [vmem:[#allocation5 + $0x518] sm:$0xff]  ;;  %v2088_v60 = vpack.c.bf16 %v655_v54, %v653_v52  ;;  %v786_v62 = vld [vmem:[#allocation5 + $0x900] sm:$0xff]  ;;  %v671_v46 = vld [vmem:[#allocation5 + $0x570] sm:$0xff] }
  0xee   : > { %529 = vmatmul.mubr.f32.gmra.mrb[6].mxu1 %v2915_v2  ;;  %2071 = vmatprep.subr.bf16.mxu0 %v2070_v63  ;;  %v788_v63 = vld [vmem:[#allocation5 + $0x910] sm:$0xff]  ;;  %v2090_v1 = vpack.c.bf16 %v660_v58, %v658_v57  ;;  %v2104_v52 = vpack.c.bf16 %v671_v46, %v669_v44  ;;  %v802_v54 = vld [vmem:[#allocation5 + $0x980] sm:$0xff]  ;;  %v688_v28 = vld [vmem:[#allocation5 + $0x5f8] sm:$0xff] }
  0xef   : > { %618 = vmatmul.mubr.f32.gmra.mrb[6].mxu0 %v316_v3  ;;  %1945 = vmatpush1.bf16.msra.mxu1 %v1944_v4  ;;  %v659_v3 = vld [vmem:[#allocation5 + $0x510] sm:$0xff]  ;;  %v791_v4 = vld [vmem:[#allocation5 + $0x928] sm:$0xff]  ;;  %v1964_v8 = vpack.c.bf16 %v788_v63, %v786_v62  ;;  %v680_v62 = vld [vmem:[#allocation5 + $0x5b8] sm:$0xff]  ;;  %v1980_v63 = vpack.c.bf16 %v804_v55, %v802_v54 }
  0xf0   : > { %2073 = vmatpush1.bf16.msra.mxu0 %v2072_v5  ;;  %1947 = vmatprep.subr.bf16.mxu1 %v1946_v6  ;;  %v793_v5 = vld [vmem:[#allocation5 + $0x938] sm:$0xff]  ;;  %v662_v6 = vld [vmem:[#allocation5 + $0x528] sm:$0xff]  ;;  %v2092_v10 = vpack.c.bf16 %v659_v3, %v657_v0  ;;  %v675_v58 = vld [vmem:[#allocation5 + $0x590] sm:$0xff] }
  0xf1   : > { %2075 = vmatprep.subr.bf16.mxu0 %v2074_v11  ;;  %946 = vmatprep.mubr.f32.mxu1 %v2878_v16  ;;  %v1966_v11 = vpack.c.bf16 %v793_v5, %v791_v4  ;;  %v2094_v15 = vpack.c.bf16 %v664_v7, %v662_v6  ;;  %v2108_v0 = vpack.c.bf16 %v675_v58, %v673_v56  ;;  %v806_v3 = vld [vmem:[#allocation5 + $0x9a0] sm:$0xff]  ;;  %v808_v4 = vld [vmem:[#allocation5 + $0x9b0] sm:$0xff]  ;;  %v696_v54 = vld [vmem:[#allocation5 + $0x638] sm:$0xff] }
  0xf2   : > { %1206 = vmatprep.mubr.f32.mxu0 %v2878_v16  ;;  %v2084_v16 = vpack.c.bf16 %v651_v41, %v649_v39  ;;  %v2100_v39 = vpack.c.bf16 %v667_v32, %v665_v30  ;;  %v798_v41 = vld [vmem:[#allocation5 + $0x960] sm:$0xff]  ;;  %v679_v7 = vld [vmem:[#allocation5 + $0x5b0] sm:$0xff]  ;;  %v1984_v13 = vpack.c.bf16 %v808_v4, %v806_v3  ;;  %v700_v3 = vld [vmem:[#allocation5 + $0x658] sm:$0xff] }
  0xf3   : > { %1949 = vmatpush1.bf16.msra.mxu1 %v1948_v20  ;;  %v795_v20 = vld [vmem:[#allocation5 + $0x948] sm:$0xff]  ;;  %v1976_v50 = vpack.c.bf16 %v800_v43, %v798_v41  ;;  %v677_v5 = vld [vmem:[#allocation5 + $0x5a0] sm:$0xff]  ;;  %v692_v41 = vld [vmem:[#allocation5 + $0x618] sm:$0xff] }
  0xf4   : > { %2077 = vmatpush1.bf16.msra.mxu0 %v2076_v21  ;;  %1951 = vmatprep.subr.bf16.mxu1 %v1950_v22  ;;  %v797_v21 = vld [vmem:[#allocation5 + $0x958] sm:$0xff]  ;;  %v666_v22 = vld [vmem:[#allocation5 + $0x548] sm:$0xff]  ;;  %v2112_v14 = vpack.c.bf16 %v679_v7, %v677_v5  ;;  %v814_v32 = vld [vmem:[#allocation5 + $0x9e0] sm:$0xff] }
  0xf5   : > { %2079 = vmatprep.subr.bf16.mxu0 %v2078_v27  ;;  %v1970_v27 = vpack.c.bf16 %v797_v21, %v795_v20  ;;  %v2098_v31 = vpack.c.bf16 %v668_v23, %v666_v22  ;;  %v812_v20 = vld [vmem:[#allocation5 + $0x9d0] sm:$0xff]  ;;  %v681_v21 = vld [vmem:[#allocation5 + $0x5c0] sm:$0xff] }
  0xf6   : > { %v683_v23 = vld [vmem:[#allocation5 + $0x5d0] sm:$0xff]  ;;  %v1988_v29 = vpack.c.bf16 %v812_v20, %v810_v17  ;;  %v818_v46 = vld [vmem:[#allocation5 + $0xa00] sm:$0xff]  ;;  %v704_v17 = vld [vmem:[#allocation5 + $0x678] sm:$0xff] }
  0xf7   : > { %1953 = vmatpush1.bf16.msra.mxu1 %v1952_v33  ;;  %v799_v33 = vld [vmem:[#allocation5 + $0x968] sm:$0xff]  ;;  %v2116_v30 = vpack.c.bf16 %v683_v23, %v681_v21  ;;  %v822_v58 = vld [vmem:[#allocation5 + $0xa20] sm:$0xff]  ;;  %v832_v23 = vld [vmem:[#allocation5 + $0xa70] sm:$0xff] }
  0xf8   : > { %2081 = vmatpush1.bf16.msra.mxu0 %v2080_v34  ;;  %1955 = vmatprep.subr.bf16.mxu1 %v1954_v36  ;;  %v801_v34 = vld [vmem:[#allocation5 + $0x978] sm:$0xff]  ;;  %v670_v36 = vld [vmem:[#allocation5 + $0x568] sm:$0xff]  ;;  %v826_v7 = vld [vmem:[#allocation5 + $0xa40] sm:$0xff] }
  0xf9   : > { %2083 = vmatprep.subr.bf16.mxu0 %v2082_v40  ;;  %v1974_v40 = vpack.c.bf16 %v801_v34, %v799_v33  ;;  %v2102_v45 = vpack.c.bf16 %v672_v37, %v670_v36  ;;  %v816_v33 = vld [vmem:[#allocation5 + $0x9f0] sm:$0xff]  ;;  %v685_v34 = vld [vmem:[#allocation5 + $0x5e0] sm:$0xff] }
  0xfa   : > { %v687_v37 = vld [vmem:[#allocation5 + $0x5f0] sm:$0xff]  ;;  %v1992_v43 = vpack.c.bf16 %v816_v33, %v814_v32  ;;  %v834_v33 = vld [vmem:[#allocation5 + $0xa80] sm:$0xff] }
  0xfb   : > { %1957 = vmatpush1.bf16.msra.mxu1 %v1956_v47  ;;  %v803_v47 = vld [vmem:[#allocation5 + $0x988] sm:$0xff]  ;;  %v2120_v44 = vpack.c.bf16 %v687_v37, %v685_v34  ;;  %v836_v34 = vld [vmem:[#allocation5 + $0xa90] sm:$0xff] }
  0xfc   : > { %2085 = vmatpush1.bf16.msra.mxu0 %v2084_v16  ;;  %1959 = vmatprep.subr.bf16.mxu1 %v1958_v48  ;;  %v805_v16 = vld [vmem:[#allocation5 + $0x998] sm:$0xff]  ;;  %v674_v48 = vld [vmem:[#allocation5 + $0x588] sm:$0xff] }
  0xfd   : > { %2087 = vmatprep.subr.bf16.mxu0 %v2086_v53  ;;  %v1978_v53 = vpack.c.bf16 %v805_v16, %v803_v47  ;;  %v2106_v57 = vpack.c.bf16 %v676_v49, %v674_v48  ;;  %v820_v47 = vld [vmem:[#allocation5 + $0xa10] sm:$0xff]  ;;  %v689_v16 = vld [vmem:[#allocation5 + $0x600] sm:$0xff] }
  0xfe   : > { %v691_v49 = vld [vmem:[#allocation5 + $0x610] sm:$0xff]  ;;  %v1996_v55 = vpack.c.bf16 %v820_v47, %v818_v46  ;;  %v709_v47 = vld [vmem:[#allocation5 + $0x6a0] sm:$0xff] }
  0xff   : > { %1961 = vmatpush1.bf16.msra.mxu1 %v1960_v59  ;;  %v807_v59 = vld [vmem:[#allocation5 + $0x9a8] sm:$0xff]  ;;  %v2124_v56 = vpack.c.bf16 %v691_v49, %v689_v16  ;;  %v840_v46 = vld [vmem:[#allocation5 + $0xab0] sm:$0xff] }
 0x100   : > { %2089 = vmatpush1.bf16.msra.mxu0 %v2088_v60  ;;  %1963 = vmatprep.subr.bf16.mxu1 %v1962_v61  ;;  %v809_v60 = vld [vmem:[#allocation5 + $0x9b8] sm:$0xff]  ;;  %v678_v61 = vld [vmem:[#allocation5 + $0x5a8] sm:$0xff] }
 0x101   : > { %2091 = vmatprep.subr.bf16.mxu0 %v2090_v1  ;;  %v1982_v1 = vpack.c.bf16 %v809_v60, %v807_v59  ;;  %v2110_v6 = vpack.c.bf16 %v680_v62, %v678_v61  ;;  %v824_v59 = vld [vmem:[#allocation5 + $0xa30] sm:$0xff]  ;;  %v693_v60 = vld [vmem:[#allocation5 + $0x620] sm:$0xff]  ;;  %v843_v49 = vld [vmem:[#allocation5 + $0xac8] sm:$0xff] }
 0x102   : > { %v695_v62 = vld [vmem:[#allocation5 + $0x630] sm:$0xff]  ;;  %v2000_v4 = vpack.c.bf16 %v824_v59, %v822_v58 }
 0x103   : > { %1965 = vmatpush1.bf16.msra.mxu1 %v1964_v8  ;;  %v811_v8 = vld [vmem:[#allocation5 + $0x9c8] sm:$0xff]  ;;  %v2128_v5 = vpack.c.bf16 %v695_v62, %v693_v60  ;;  %v715_v59 = vld [vmem:[#allocation5 + $0x6d0] sm:$0xff] }
 0x104   : > { %2093 = vmatpush1.bf16.msra.mxu0 %v2092_v10  ;;  %1967 = vmatprep.subr.bf16.mxu1 %v1966_v11  ;;  %v813_v10 = vld [vmem:[#allocation5 + $0x9d8] sm:$0xff]  ;;  %v682_v11 = vld [vmem:[#allocation5 + $0x5c8] sm:$0xff] }
 0x105   : > { %2095 = vmatprep.subr.bf16.mxu0 %v2094_v15  ;;  %v1986_v15 = vpack.c.bf16 %v813_v10, %v811_v8  ;;  %v2114_v22 = vpack.c.bf16 %v684_v12, %v682_v11  ;;  %v828_v8 = vld [vmem:[#allocation5 + $0xa50] sm:$0xff]  ;;  %v697_v10 = vld [vmem:[#allocation5 + $0x640] sm:$0xff]  ;;  %v847_v60 = vld [vmem:[#allocation5 + $0xae8] sm:$0xff] }
 0x106   : > { %v699_v12 = vld [vmem:[#allocation5 + $0x650] sm:$0xff]  ;;  %v718_v62 = vld [vmem:[#allocation5 + $0x6e8] sm:$0xff] }
 0x107   : > { %1969 = vmatpush1.bf16.msra.mxu1 %v1968_v24  ;;  %v815_v24 = vld [vmem:[#allocation5 + $0x9e8] sm:$0xff]  ;;  %v2132_v20 = vpack.c.bf16 %v699_v12, %v697_v10  ;;  %v853_v10 = vld [vmem:[#allocation5 + $0xb18] sm:$0xff] }
 0x108   : > { %2097 = vmatpush1.bf16.msra.mxu0 %v2096_v25  ;;  %1971 = vmatprep.subr.bf16.mxu1 %v1970_v27  ;;  %v817_v25 = vld [vmem:[#allocation5 + $0x9f8] sm:$0xff]  ;;  %v686_v27 = vld [vmem:[#allocation5 + $0x5e8] sm:$0xff] }
 0x109   : > { %2099 = vmatprep.subr.bf16.mxu0 %v2098_v31  ;;  %v1990_v31 = vpack.c.bf16 %v817_v25, %v815_v24  ;;  %v2118_v36 = vpack.c.bf16 %v688_v28, %v686_v27  ;;  %v701_v24 = vld [vmem:[#allocation5 + $0x660] sm:$0xff]  ;;  %v703_v27 = vld [vmem:[#allocation5 + $0x670] sm:$0xff]  ;;  %v835_v28 = vld [vmem:[#allocation5 + $0xa88] sm:$0xff] }
 0x10a   : > { %v724_v12 = vld [vmem:[#allocation5 + $0x718] sm:$0xff] }
 0x10b   : > { %1973 = vmatpush1.bf16.msra.mxu1 %v1972_v38  ;;  %v819_v38 = vld [vmem:[#allocation5 + $0xa08] sm:$0xff] }
 0x10c   : > { %2101 = vmatpush1.bf16.msra.mxu0 %v2100_v39  ;;  %1975 = vmatprep.subr.bf16.mxu1 %v1974_v40  ;;  %v821_v39 = vld [vmem:[#allocation5 + $0xa18] sm:$0xff]  ;;  %v690_v40 = vld [vmem:[#allocation5 + $0x608] sm:$0xff] }
 0x10d   : > { %2103 = vmatprep.subr.bf16.mxu0 %v2102_v45  ;;  %v1994_v45 = vpack.c.bf16 %v821_v39, %v819_v38  ;;  %v2122_v48 = vpack.c.bf16 %v692_v41, %v690_v40  ;;  %v707_v38 = vld [vmem:[#allocation5 + $0x690] sm:$0xff]  ;;  %v839_v39 = vld [vmem:[#allocation5 + $0xaa8] sm:$0xff]  ;;  %v841_v40 = vld [vmem:[#allocation5 + $0xab8] sm:$0xff] }
 0x10e   : > { %v712_v41 = vld [vmem:[#allocation5 + $0x6b8] sm:$0xff] }
 0x10f   : > { %1977 = vmatpush1.bf16.msra.mxu1 %v1976_v50  ;;  %v823_v50 = vld [vmem:[#allocation5 + $0xa28] sm:$0xff] }
 0x110   : > { %2105 = vmatpush1.bf16.msra.mxu0 %v2104_v52  ;;  %1979 = vmatprep.subr.bf16.mxu1 %v1978_v53  ;;  %v825_v52 = vld [vmem:[#allocation5 + $0xa38] sm:$0xff]  ;;  %v694_v53 = vld [vmem:[#allocation5 + $0x628] sm:$0xff] }
 0x111   : > { %2107 = vmatprep.subr.bf16.mxu0 %v2106_v57  ;;  %v1998_v57 = vpack.c.bf16 %v825_v52, %v823_v50  ;;  %v2126_v61 = vpack.c.bf16 %v696_v54, %v694_v53  ;;  %v845_v50 = vld [vmem:[#allocation5 + $0xad8] sm:$0xff] }
 0x112   : > { %v716_v52 = vld [vmem:[#allocation5 + $0x6d8] sm:$0xff]  ;;  %v2018_v54 = vpack.c.bf16 %v845_v50, %v843_v49 }
 0x113   : > { %1981 = vmatpush1.bf16.msra.mxu1 %v1980_v63  ;;  %v827_v63 = vld [vmem:[#allocation5 + $0xa48] sm:$0xff] }
 0x114   : > { %2109 = vmatpush1.bf16.msra.mxu0 %v2108_v0  ;;  %1983 = vmatprep.subr.bf16.mxu1 %v1982_v1  ;;  %v829_v0 = vld [vmem:[#allocation5 + $0xa58] sm:$0xff]  ;;  %v698_v1 = vld [vmem:[#allocation5 + $0x648] sm:$0xff] }
 0x115   : > { %2111 = vmatprep.subr.bf16.mxu0 %v2110_v6  ;;  %v2002_v6 = vpack.c.bf16 %v829_v0, %v827_v63  ;;  %v2130_v11 = vpack.c.bf16 %v700_v3, %v698_v1  ;;  %v720_v63 = vld [vmem:[#allocation5 + $0x6f8] sm:$0xff]  ;;  %v846_v3 = vld [vmem:[#allocation5 + $0xae0] sm:$0xff] }
 0x117   : > { %1985 = vmatpush1.bf16.msra.mxu1 %v1984_v13  ;;  %v831_v13 = vld [vmem:[#allocation5 + $0xa68] sm:$0xff] }
 0x118   : > { %2113 = vmatpush1.bf16.msra.mxu0 %v2112_v14  ;;  %1987 = vmatprep.subr.bf16.mxu1 %v1986_v15  ;;  %v833_v14 = vld [vmem:[#allocation5 + $0xa78] sm:$0xff]  ;;  %v702_v15 = vld [vmem:[#allocation5 + $0x668] sm:$0xff] }
 0x119   : > { %2115 = vmatprep.subr.bf16.mxu0 %v2114_v22  ;;  %v2006_v21 = vpack.c.bf16 %v833_v14, %v831_v13  ;;  %v830_v22 = vld [vmem:[#allocation5 + $0xa60] sm:$0xff]  ;;  %v2134_v25 = vpack.c.bf16 %v704_v17, %v702_v15 }
 0x11a   : > { %v850_v17 = vld [vmem:[#allocation5 + $0xb00] sm:$0xff] }
 0x11b   : > { %1989 = vmatpush1.bf16.msra.mxu1 %v1988_v29  ;;  %v837_v29 = vld [vmem:[#allocation5 + $0xa98] sm:$0xff] }
 0x11c   : > { %2117 = vmatpush1.bf16.msra.mxu0 %v2116_v30  ;;  %1991 = vmatprep.subr.bf16.mxu1 %v1990_v31  ;;  %v708_v30 = vld [vmem:[#allocation5 + $0x698] sm:$0xff]  ;;  %v2136_v31 = vpack.c.bf16 %v703_v27, %v701_v24  ;;  %v2010_v32 = vpack.c.bf16 %v837_v29, %v835_v28 }
 0x11d   : > { %2119 = vmatprep.subr.bf16.mxu0 %v2118_v36  ;;  %v705_v36 = vld [vmem:[#allocation5 + $0x680] sm:$0xff]  ;;  %v857_v24 = vld [vmem:[#allocation5 + $0xb38] sm:$0xff] }
 0x11e   : > { %v728_v27 = vld [vmem:[#allocation5 + $0x738] sm:$0xff] }
 0x11f   : > { %1993 = vmatpush1.bf16.msra.mxu1 %v1992_v43  ;;  %v2140_v43 = vpack.c.bf16 %v707_v38, %v705_v36  ;;  %v861_v36 = vld [vmem:[#allocation5 + $0xb58] sm:$0xff] }
 0x120   : > { %2121 = vmatpush1.bf16.msra.mxu0 %v2120_v44  ;;  %1995 = vmatprep.subr.bf16.mxu1 %v1994_v45  ;;  %v2014_v44 = vpack.c.bf16 %v841_v40, %v839_v39  ;;  %v838_v45 = vld [vmem:[#allocation5 + $0xaa0] sm:$0xff]  ;;  %v732_v38 = vld [vmem:[#allocation5 + $0x758] sm:$0xff] }
 0x121   : > { %2123 = vmatprep.subr.bf16.mxu0 %v2122_v48  ;;  %v711_v48 = vld [vmem:[#allocation5 + $0x6b0] sm:$0xff] }
 0x122   : > { %947 = vmatmul.mubr.f32.vlgmr.msra.gmra.mrb[8].mxu1 %v2886_v9  ;;  %v2144_v53 = vpack.c.bf16 %v711_v48, %v709_v47  ;;  %v865_v47 = vld [vmem:[#allocation5 + $0xb78] sm:$0xff] }
 0x123   : > { %1997 = vmatpush1.bf16.msra.mxu1 %v1996_v55  ;;  %1207 = vmatmul.mubr.f32.vlgmr.msra.gmra.mrb[8].mxu0 %v2886_v9  ;;  %v2004_v9 = vpack.c.bf16 %v828_v8, %v826_v7  ;;  %v842_v55 = vld [vmem:[#allocation5 + $0xac0] sm:$0xff]  ;;  %v719_v7 = vld [vmem:[#allocation5 + $0x6f0] sm:$0xff]  ;;  %v851_v8 = vld [vmem:[#allocation5 + $0xb08] sm:$0xff] }
 0x124   : > { %2125 = vmatpush1.bf16.msra.mxu0 %v2124_v56  ;;  %1999 = vmatprep.subr.bf16.mxu1 %v1998_v57  ;;  %v844_v56 = vld [vmem:[#allocation5 + $0xad0] sm:$0xff]  ;;  %v713_v57 = vld [vmem:[#allocation5 + $0x6c0] sm:$0xff]  ;;  %v2026_v15 = vpack.c.bf16 %v853_v10, %v851_v8  ;;  %v736_v48 = vld [vmem:[#allocation5 + $0x778] sm:$0xff] }
 0x125   : > { %2127 = vmatprep.subr.bf16.mxu0 %v2126_v61  ;;  %952 = vmatprep.mubr.f32.mxu1 %v2890_v18  ;;  %v849_v61 = vld [vmem:[#allocation5 + $0xaf8] sm:$0xff]  ;;  %v2020_v0 = vpack.c.bf16 %v844_v56, %v842_v55  ;;  %v735_v55 = vld [vmem:[#allocation5 + $0x770] sm:$0xff]  ;;  %v867_v56 = vld [vmem:[#allocation5 + $0xb88] sm:$0xff] }
 0x126   : > { %1212 = vmatprep.mubr.f32.mxu0 %v2890_v18  ;;  %953 = vmatmul.mubr.f32.gmra.mrb[10].mxu1 %v2894_v26  ;;  %v706_v18 = vld [vmem:[#allocation5 + $0x688] sm:$0xff]  ;;  %v2022_v1 = vpack.c.bf16 %v849_v61, %v847_v60 }
 0x127   : > { %2001 = vmatpush1.bf16.msra.mxu1 %v2000_v4  ;;  %1213 = vmatmul.mubr.f32.gmra.mrb[10].mxu0 %v2894_v26  ;;  %v2008_v26 = vpack.c.bf16 %v832_v23, %v830_v22  ;;  %v2138_v37 = vpack.c.bf16 %v708_v30, %v706_v18  ;;  %v848_v4 = vld [vmem:[#allocation5 + $0xaf0] sm:$0xff]  ;;  %v855_v23 = vld [vmem:[#allocation5 + $0xb28] sm:$0xff]  ;;  %v854_v30 = vld [vmem:[#allocation5 + $0xb20] sm:$0xff] }
 0x128   : > { %2129 = vmatpush1.bf16.msra.mxu0 %v2128_v5  ;;  %2003 = vmatprep.subr.bf16.mxu1 %v2002_v6  ;;  %v717_v5 = vld [vmem:[#allocation5 + $0x6e0] sm:$0xff]  ;;  %v2150_v6 = vpack.c.bf16 %v720_v63, %v718_v62  ;;  %v2024_v13 = vpack.c.bf16 %v848_v4, %v846_v3  ;;  %v723_v22 = vld [vmem:[#allocation5 + $0x710] sm:$0xff]  ;;  %v2030_v18 = vpack.c.bf16 %v857_v24, %v855_v23  ;;  %v871_v4 = vld [vmem:[#allocation5 + $0xba8] sm:$0xff] }
 0x129   : > { %2131 = vmatprep.subr.bf16.mxu0 %v2130_v11  ;;  %958 = vmatprep.mubr.f32.mxu1 %v2899_v35  ;;  %v722_v11 = vld [vmem:[#allocation5 + $0x708] sm:$0xff]  ;;  %v2152_v14 = vpack.c.bf16 %v719_v7, %v717_v5  ;;  %v866_v63 = vld [vmem:[#allocation5 + $0xb80] sm:$0xff]  ;;  %v739_v3 = vld [vmem:[#allocation5 + $0x790] sm:$0xff] }
 0x12a   : > { %1218 = vmatprep.mubr.f32.mxu0 %v2899_v35  ;;  %959 = vmatmul.mubr.f32.gmra.mrb[12].mxu1 %v2904_v42  ;;  %v710_v35 = vld [vmem:[#allocation5 + $0x6a8] sm:$0xff]  ;;  %v873_v5 = vld [vmem:[#allocation5 + $0xbb8] sm:$0xff] }
 0x12b   : > { %2005 = vmatpush1.bf16.msra.mxu1 %v2004_v9  ;;  %1219 = vmatmul.mubr.f32.gmra.mrb[12].mxu0 %v2904_v42  ;;  %v2012_v42 = vpack.c.bf16 %v836_v34, %v834_v33  ;;  %v2142_v16 = vpack.c.bf16 %v712_v41, %v710_v35  ;;  %v852_v9 = vld [vmem:[#allocation5 + $0xb10] sm:$0xff]  ;;  %v859_v34 = vld [vmem:[#allocation5 + $0xb48] sm:$0xff]  ;;  %v858_v41 = vld [vmem:[#allocation5 + $0xb40] sm:$0xff] }
 0x12c   : > { %2133 = vmatpush1.bf16.msra.mxu0 %v2132_v20  ;;  %2007 = vmatprep.subr.bf16.mxu1 %v2006_v21  ;;  %v721_v20 = vld [vmem:[#allocation5 + $0x700] sm:$0xff]  ;;  %v2154_v21 = vpack.c.bf16 %v724_v12, %v722_v11  ;;  %v2028_v28 = vpack.c.bf16 %v852_v9, %v850_v17  ;;  %v727_v33 = vld [vmem:[#allocation5 + $0x730] sm:$0xff]  ;;  %v2034_v35 = vpack.c.bf16 %v861_v36, %v859_v34  ;;  %v744_v7 = vld [vmem:[#allocation5 + $0x7b8] sm:$0xff] }
 0x12d   : > { %2135 = vmatprep.subr.bf16.mxu0 %v2134_v25  ;;  %964 = vmatprep.mubr.f32.mxu1 %v2909_v51  ;;  %v726_v25 = vld [vmem:[#allocation5 + $0x728] sm:$0xff]  ;;  %v2156_v29 = vpack.c.bf16 %v723_v22, %v721_v20  ;;  %v2046_v11 = vpack.c.bf16 %v873_v5, %v871_v4  ;;  %v870_v12 = vld [vmem:[#allocation5 + $0xba0] sm:$0xff]  ;;  %v743_v17 = vld [vmem:[#allocation5 + $0x7b0] sm:$0xff] }
 0x12e   : > { %1224 = vmatprep.mubr.f32.mxu0 %v2909_v51  ;;  %965 = vmatmul.mubr.f32.gmra.mrb[14].mxu1 %v2915_v2  ;;  %v714_v51 = vld [vmem:[#allocation5 + $0x6c8] sm:$0xff]  ;;  %v877_v20 = vld [vmem:[#allocation5 + $0xbd8] sm:$0xff]  ;;  %v2373_v5 = vld [vmem:[%s2863_s14 + $0x50] sm:$0xff] }
 0x12f   : > { %2009 = vmatpush1.bf16.msra.mxu1 %v2008_v26  ;;  %1225 = vmatmul.mubr.f32.gmra.mrb[14].mxu0 %v2915_v2  ;;  %v2016_v2 = vpack.c.bf16 %v840_v46, %v838_v45  ;;  %v2146_v58 = vpack.c.bf16 %v716_v52, %v714_v51  ;;  %v856_v26 = vld [vmem:[#allocation5 + $0xb30] sm:$0xff]  ;;  %v863_v46 = vld [vmem:[#allocation5 + $0xb68] sm:$0xff]  ;;  %v862_v52 = vld [vmem:[#allocation5 + $0xb60] sm:$0xff] }
 0x130   : > { %2137 = vmatpush1.bf16.msra.mxu0 %v2136_v31  ;;  %2011 = vmatprep.subr.bf16.mxu1 %v2010_v32  ;;  %v725_v31 = vld [vmem:[#allocation5 + $0x720] sm:$0xff]  ;;  %v2158_v32 = vpack.c.bf16 %v728_v27, %v726_v25  ;;  %v2032_v39 = vpack.c.bf16 %v856_v26, %v854_v30  ;;  %v731_v45 = vld [vmem:[#allocation5 + $0x750] sm:$0xff]  ;;  %v2038_v51 = vpack.c.bf16 %v865_v47, %v863_v46  ;;  %v875_v9 = vld [vmem:[#allocation5 + $0xbc8] sm:$0xff] }
 0x131   : > { %2139 = vmatprep.subr.bf16.mxu0 %v2138_v37  ;;  %1035 = vmatprep.mubr.f32.mxu1 %v2882_v19  ;;  %v730_v37 = vld [vmem:[#allocation5 + $0x748] sm:$0xff]  ;;  %v2160_v40 = vpack.c.bf16 %v727_v33, %v725_v31  ;;  %v748_v22 = vld [vmem:[#allocation5 + $0x7d8] sm:$0xff]  ;;  %v2050_v25 = vpack.c.bf16 %v877_v20, %v875_v9  ;;  %v874_v27 = vld [vmem:[#allocation5 + $0xbc0] sm:$0xff] }
 0x132   : > { %1295 = vmatprep.mubr.f32.mxu0 %v2882_v19  ;;  %v2148_v19 = vpack.c.bf16 %v715_v59, %v713_v57  ;;  %v869_v57 = vld [vmem:[#allocation5 + $0xb98] sm:$0xff]  ;;  %v747_v30 = vld [vmem:[#allocation5 + $0x7d0] sm:$0xff]  ;;  %v879_v26 = vld [vmem:[#allocation5 + $0xbe8] sm:$0xff] }
 0x133   : > { %2013 = vmatpush1.bf16.msra.mxu1 %v2012_v42  ;;  %v860_v42 = vld [vmem:[#allocation5 + $0xb50] sm:$0xff]  ;;  %v740_v59 = vld [vmem:[#allocation5 + $0x798] sm:$0xff]  ;;  %v2042_v62 = vpack.c.bf16 %v869_v57, %v867_v56  ;;  %v1385_v47 = vld [vmem:[#allocation8] sm:$0xff] }
 0x134   : > { %2141 = vmatpush1.bf16.msra.mxu0 %v2140_v43  ;;  %2015 = vmatprep.subr.bf16.mxu1 %v2014_v44  ;;  %v729_v43 = vld [vmem:[#allocation5 + $0x740] sm:$0xff]  ;;  %v2162_v44 = vpack.c.bf16 %v732_v38, %v730_v37  ;;  %v2036_v49 = vpack.c.bf16 %v860_v42, %v858_v41  ;;  %v881_v31 = vld [vmem:[#allocation5 + $0xbf8] sm:$0xff]  ;;  %v751_v41 = vld [vmem:[#allocation5 + $0x7f0] sm:$0xff] }
 0x135   : > { %2143 = vmatprep.subr.bf16.mxu0 %v2142_v16  ;;  %v734_v16 = vld [vmem:[#allocation5 + $0x768] sm:$0xff]  ;;  %v2164_v50 = vpack.c.bf16 %v731_v45, %v729_v43  ;;  %v752_v33 = vld [vmem:[#allocation5 + $0x7f8] sm:$0xff]  ;;  %v2054_v37 = vpack.c.bf16 %v881_v31, %v879_v26  ;;  %v878_v38 = vld [vmem:[#allocation5 + $0xbe0] sm:$0xff] }
 0x136   : > { %v1401_v42 = vld [vmem:[#allocation8 + $0x80] sm:$0xff]  ;;  %v1402_v43 = vld [vmem:[#allocation8 + $0x88] sm:$0xff]  ;;  %v2370_v56 = vld [vmem:[%s2863_s14 + $0x38] sm:$0xff] }
 0x137   : > { %2017 = vmatpush1.bf16.msra.mxu1 %v2016_v2  ;;  %v864_v2 = vld [vmem:[#allocation5 + $0xb70] sm:$0xff]  ;;  %v2186_v46 = vpack.c.bf16 %v1402_v43, %v1401_v42  ;;  %v1392_v4 = vld [vmem:[#allocation8 + $0x38] sm:$0xff] }
 0x138   : > { %2145 = vmatpush1.bf16.msra.mxu0 %v2144_v53  ;;  %2019 = vmatprep.subr.bf16.mxu1 %v2018_v54  ;;  %v733_v53 = vld [vmem:[#allocation5 + $0x760] sm:$0xff]  ;;  %v2166_v54 = vpack.c.bf16 %v736_v48, %v734_v16  ;;  %v2040_v60 = vpack.c.bf16 %v864_v2, %v862_v52  ;;  %v1386_v16 = vld [vmem:[#allocation8 + $0x8] sm:$0xff]  ;;  %v1403_v48 = vld [vmem:[#allocation8 + $0x90] sm:$0xff] }
 0x139   : > { %2147 = vmatprep.subr.bf16.mxu0 %v2146_v58  ;;  %v738_v58 = vld [vmem:[#allocation5 + $0x788] sm:$0xff]  ;;  %v2168_v61 = vpack.c.bf16 %v735_v55, %v733_v53  ;;  %v1387_v52 = vld [vmem:[#allocation8 + $0x10] sm:$0xff]  ;;  %v1388_v2 = vld [vmem:[#allocation8 + $0x18] sm:$0xff] }
 0x13a   : > { %v2369_v53 = vld [vmem:[%s2863_s14 + $0x10] sm:$0xff]  ;;  %v2192_v57 = vpack.c.bf16 %v1388_v2, %v1387_v52  ;;  %v1416_v2 = vld [vmem:[#allocation8 + $0xf8] sm:$0xff] }
 0x13b   : > { %2021 = vmatpush1.bf16.msra.mxu1 %v2020_v0  ;;  %v868_v0 = vld [vmem:[#allocation5 + $0xb90] sm:$0xff] }
 0x13c   : > { %2149 = vmatpush1.bf16.msra.mxu0 %v2148_v19  ;;  %2023 = vmatprep.subr.bf16.mxu1 %v2022_v1  ;;  %v737_v19 = vld [vmem:[#allocation5 + $0x780] sm:$0xff]  ;;  %v2170_v1 = vpack.c.bf16 %v740_v59, %v738_v58  ;;  %v2044_v8 = vpack.c.bf16 %v868_v0, %v866_v63  ;;  %v1406_v55 = vld [vmem:[#allocation8 + $0xa8] sm:$0xff]  ;;  %v2372_v0 = vld [vmem:[%s2863_s14 + $0x58] sm:$0xff] }
 0x13d   : > { %2151 = vmatprep.subr.bf16.mxu0 %v2150_v6  ;;  %v742_v6 = vld [vmem:[#allocation5 + $0x7a8] sm:$0xff]  ;;  %v2172_v10 = vpack.c.bf16 %v739_v3, %v737_v19  ;;  %v1408_v63 = vld [vmem:[#allocation8 + $0xb8] sm:$0xff]  ;;  %v1391_v3 = vld [vmem:[#allocation8 + $0x30] sm:$0xff] }
 0x13e   : > { %v1389_v59 = vld [vmem:[#allocation8 + $0x20] sm:$0xff]  ;;  %v1415_v52 = vld [vmem:[#allocation8 + $0xf0] sm:$0xff] }
 0x13f   : > { %2025 = vmatpush1.bf16.msra.mxu1 %v2024_v13  ;;  %v872_v13 = vld [vmem:[#allocation5 + $0xbb0] sm:$0xff] }
 0x140   : > { %2153 = vmatpush1.bf16.msra.mxu0 %v2152_v14  ;;  %2027 = vmatprep.subr.bf16.mxu1 %v2026_v15  ;;  %v741_v14 = vld [vmem:[#allocation5 + $0x7a0] sm:$0xff]  ;;  %v2174_v15 = vpack.c.bf16 %v744_v7, %v742_v6  ;;  %v2048_v23 = vpack.c.bf16 %v872_v13, %v870_v12  ;;  %v2374_v6 = vld [vmem:[%s2863_s14 + $0x78] sm:$0xff]  ;;  %v2200_v7 = vpack.c.bf16 %v1392_v4, %v1391_v3  ;;  %v1060_v12 = vlaneseq }
 0x141   : > { %2155 = vmatprep.subr.bf16.mxu0 %v2154_v21  ;;  %v746_v21 = vld [vmem:[#allocation5 + $0x7c8] sm:$0xff]  ;;  %v2176_v24 = vpack.c.bf16 %v743_v17, %v741_v14 }
 0x142   : > { %v1393_v14 = vld [vmem:[#allocation8 + $0x40] sm:$0xff] }
 0x143   : > { %2029 = vmatpush1.bf16.msra.mxu1 %v2028_v28  ;;  %v876_v28 = vld [vmem:[#allocation5 + $0xbd0] sm:$0xff] }
 0x144   : > { %2157 = vmatpush1.bf16.msra.mxu0 %v2156_v29  ;;  %2031 = vmatprep.subr.bf16.mxu1 %v2030_v18  ;;  %v745_v29 = vld [vmem:[#allocation5 + $0x7c0] sm:$0xff]  ;;  %v2178_v18 = vpack.c.bf16 %v748_v22, %v746_v21  ;;  %v2052_v34 = vpack.c.bf16 %v876_v28, %v874_v27  ;;  %v2949_v28 = vshrl.u32 %v1060_v12, 7 }
 0x145   : > { %2159 = vmatprep.subr.bf16.mxu0 %v2158_v32  ;;  %v750_v32 = vld [vmem:[#allocation5 + $0x7e8] sm:$0xff]  ;;  %v2180_v36 = vpack.c.bf16 %v747_v30, %v745_v29  ;;  %v1396_v30 = vld [vmem:[#allocation8 + $0x58] sm:$0xff] }
 0x146   : > { %vm1125_vm0 = vcmp.lt.s32.totalorder %v2949_v28, 1  ;;  %v1069_v12 = vand.u32 15, %v2949_v28  ;;  %vm1332_vm2 = vcmp.lt.s32.totalorder %v2949_v28, 7 }
 0x147   : > { %2033 = vmatpush1.bf16.msra.mxu1 %v2032_v39  ;;  %v880_v39 = vld [vmem:[#allocation5 + $0xbf0] sm:$0xff] }
 0x148   : > { %2161 = vmatpush1.bf16.msra.mxu0 %v2160_v40  ;;  %2035 = vmatprep.subr.bf16.mxu1 %v2034_v35  ;;  %v2182_v40 = vpack.c.bf16 %v752_v33, %v750_v32  ;;  %v749_v35 = vld [vmem:[#allocation5 + $0x7e0] sm:$0xff]  ;;  %vm1113_vm1 = vcmp.eq.s32.totalorder %v1069_v12, 0 }
 0x149   : > { %2163 = vmatprep.subr.bf16.mxu0 %v2162_v44  ;;  %v2056_v44 = vpack.c.bf16 %v880_v39, %v878_v38  ;;  %v2184_v45 = vpack.c.bf16 %v751_v41, %v749_v35  ;;  %v1414_v38 = vld [vmem:[#allocation8 + $0xe8] sm:$0xff]  ;;  %v1397_v35 = vld [vmem:[#allocation8 + $0x60] sm:$0xff] }
 0x14a   : > { %v1398_v41 = vld [vmem:[#allocation8 + $0x68] sm:$0xff] }
 0x14b   : > { %2037 = vmatpush1.bf16.msra.mxu1 %v2036_v49  ;;  %v1404_v49 = vld [vmem:[#allocation8 + $0x98] sm:$0xff] }
 0x14c   : > { %2165 = vmatpush1.bf16.msra.mxu0 %v2164_v50  ;;  %2039 = vmatprep.subr.bf16.mxu1 %v2038_v51  ;;  %v2188_v50 = vpack.c.bf16 %v1386_v16, %v1385_v47  ;;  %v2190_v51 = vpack.c.bf16 %v1404_v49, %v1403_v48 }
 0x14d   : > { %2167 = vmatprep.subr.bf16.mxu0 %v2166_v54  ;;  %v1405_v54 = vld [vmem:[#allocation8 + $0xa0] sm:$0xff] }
 0x14e   : > { %v2194_v58 = vpack.c.bf16 %v1406_v55, %v1405_v54  ;;  %v2214_v55 = vpack.c.bf16 %v1416_v2, %v1415_v52 }
 0x14f   : > { %2041 = vmatpush1.bf16.msra.mxu1 %v2040_v60  ;;  %v1390_v60 = vld [vmem:[#allocation8 + $0x28] sm:$0xff] }
 0x150   : > { %2169 = vmatpush1.bf16.msra.mxu0 %v2168_v61  ;;  %2043 = vmatprep.subr.bf16.mxu1 %v2042_v62  ;;  %v2371_v61 = vld [vmem:[%s2863_s14 + $0x30] sm:$0xff]  ;;  %v2196_v19 = vpack.c.bf16 %v1390_v60, %v1389_v59 }
 0x151   : > { %2171 = vmatprep.subr.bf16.mxu0 %v2170_v1  ;;  %v1407_v62 = vld [vmem:[#allocation8 + $0xb0] sm:$0xff] }
 0x152   : > { %v2198_v1 = vpack.c.bf16 %v1408_v63, %v1407_v62 }
 0x153   : > { %2045 = vmatpush1.bf16.msra.mxu1 %v2044_v8  ;;  %v2375_v8 = vld [vmem:[%s2863_s14 + $0x70] sm:$0xff] }
 0x154   : > { %2173 = vmatpush1.bf16.msra.mxu0 %v2172_v10  ;;  %2047 = vmatprep.subr.bf16.mxu1 %v2046_v11  ;;  %v1409_v10 = vld [vmem:[#allocation8 + $0xc0] sm:$0xff]  ;;  %v1410_v11 = vld [vmem:[#allocation8 + $0xc8] sm:$0xff] }
 0x155   : > { %2175 = vmatprep.subr.bf16.mxu0 %v2174_v15  ;;  %v2202_v13 = vpack.c.bf16 %v1410_v11, %v1409_v10  ;;  %v1394_v15 = vld [vmem:[#allocation8 + $0x48] sm:$0xff] }
 0x156   : > { %v2204_v9 = vpack.c.bf16 %v1394_v15, %v1393_v14 }
 0x157   : > { %2049 = vmatpush1.bf16.msra.mxu1 %v2048_v23 }
 0x158   : > { %2177 = vmatpush1.bf16.msra.mxu0 %v2176_v24  ;;  %2051 = vmatprep.subr.bf16.mxu1 %v2050_v25  ;;  %v1411_v24 = vld [vmem:[#allocation8 + $0xd0] sm:$0xff]  ;;  %v1412_v25 = vld [vmem:[#allocation8 + $0xd8] sm:$0xff] }
 0x159   : > { %2179 = vmatprep.subr.bf16.mxu0 %v2178_v18  ;;  %v2206_v29 = vpack.c.bf16 %v1412_v25, %v1411_v24  ;;  %v1395_v18 = vld [vmem:[#allocation8 + $0x50] sm:$0xff]  ;;  %v1361_v25 = vsub.s32 0, %v2949_v28 }
 0x15a   : > { %v2208_v31 = vpack.c.bf16 %v1396_v30, %v1395_v18  ;;  %v1365_v18 = vsub.s32 1, %v2949_v28 }
 0x15b   : > { %2053 = vmatpush1.bf16.msra.mxu1 %v2052_v34 }
 0x15c   : > { %2181 = vmatpush1.bf16.msra.mxu0 %v2180_v36  ;;  %2055 = vmatprep.subr.bf16.mxu1 %v2054_v37  ;;  %v1413_v37 = vld [vmem:[#allocation8 + $0xe0] sm:$0xff] }
 0x15d   : > { %2183 = vmatprep.subr.bf16.mxu0 %v2182_v40  ;;  %v2210_v40 = vpack.c.bf16 %v1414_v38, %v1413_v37 }
 0x15f   : > { %2057 = vmatpush1.bf16.msra.mxu1 %v2056_v44 }
 0x160   : > { %2185 = vmatpush1.bf16.msra.mxu0 %v2184_v45  ;;  %2226 = vmatprep.subr.bf16.mxu1 %v2186_v46  ;;  %v2212_v45 = vpack.c.bf16 %v1398_v41, %v1397_v35 }
 0x161   : > { %2187 = vmatprep.subr.bf16.mxu0 %v2186_v46 }
 0x162   : > { %1036 = vmatmul.mubr.f32.vlgmr.msra.gmra.mrb[8].mxu1 %v2369_v53 }
 0x163   : > { %1296 = vmatmul.mubr.f32.vlgmr.msra.gmra.mrb[8].mxu0 %v2369_v53  ;;  %1041 = vmatprep.mubr.f32.mxu1 %v2370_v56 }
 0x164   : > { %1301 = vmatprep.mubr.f32.mxu0 %v2370_v56  ;;  %2189 = vmatpush3.bf16.msra.mxu0 %v2188_v50  ;;  %v1399_v56 = vld [vmem:[#allocation8 + $0x70] sm:$0xff] }
 0x165   : > { %2191 = vmatprep.subr.bf16.mxu0 %v2190_v51  ;;  %2234 = vmatpush3.bf16.msra.mxu1 %v2188_v50 }
 0x166   : > { %1042 = vmatmul.mubr.f32.gmra.mrb[10].mxu1 %v2371_v61  ;;  %2227 = vmatprep.subr.bf16.mxu1 %v2190_v51 }
 0x167   : > { %1302 = vmatmul.mubr.f32.gmra.mrb[10].mxu0 %v2371_v61  ;;  %1047 = vmatprep.mubr.f32.mxu1 %v2372_v0 }
 0x168   : > { %1307 = vmatprep.mubr.f32.mxu0 %v2372_v0  ;;  %2193 = vmatpush3.bf16.msra.mxu0 %v2192_v57 }
 0x169   : > { %2195 = vmatprep.subr.bf16.mxu0 %v2194_v58  ;;  %2235 = vmatpush3.bf16.msra.mxu1 %v2192_v57  ;;  %v1400_v57 = vld [vmem:[#allocation8 + $0x78] sm:$0xff] }
 0x16a   : > { %1048 = vmatmul.mubr.f32.gmra.mrb[12].mxu1 %v2373_v5  ;;  %2228 = vmatprep.subr.bf16.mxu1 %v2194_v58  ;;  %v2216_v60 = vpack.c.bf16 %v1400_v57, %v1399_v56 }
 0x16b   : > { %1308 = vmatmul.mubr.f32.gmra.mrb[12].mxu0 %v2373_v5  ;;  %1053 = vmatprep.mubr.f32.mxu1 %v2374_v6 }
 0x16c   : > { %1313 = vmatprep.mubr.f32.mxu0 %v2374_v6  ;;  %2197 = vmatpush3.bf16.msra.mxu0 %v2196_v19 }
 0x16d   : > { %2199 = vmatprep.subr.bf16.mxu0 %v2198_v1  ;;  %2236 = vmatpush3.bf16.msra.mxu1 %v2196_v19 }
 0x16e   : > { %1054 = vmatmul.mubr.f32.gmra.mrb[14].mxu1 %v2375_v8  ;;  %2229 = vmatprep.subr.bf16.mxu1 %v2198_v1 }
 0x16f   : > { %1314 = vmatmul.mubr.f32.gmra.mrb[14].mxu0 %v2375_v8 }
 0x170   : > { %2201 = vmatpush3.bf16.msra.mxu0 %v2200_v7 }
 0x171   : > { %2237 = vmatpush3.bf16.msra.mxu1 %v2200_v7  ;;  %2203 = vmatprep.subr.bf16.mxu0 %v2202_v13 }
 0x172   : > { %2230 = vmatprep.subr.bf16.mxu1 %v2202_v13  ;;  %v1063_v13 = vadd.s32 16, %v2949_v28 }
 0x174   : > { %2205 = vmatpush3.bf16.msra.mxu0 %v2204_v9 }
 0x175   : > { %2238 = vmatpush3.bf16.msra.mxu1 %v2204_v9  ;;  %2207 = vmatprep.subr.bf16.mxu0 %v2206_v29 }
 0x176   : > { %2231 = vmatprep.subr.bf16.mxu1 %v2206_v29  ;;  %v1357_v29 = vld [vmem:[#allocation7] sm:$0x3] }
 0x178   : > { %2209 = vmatpush3.bf16.msra.mxu0 %v2208_v31 }
 0x179   : > { %2239 = vmatpush3.bf16.msra.mxu1 %v2208_v31  ;;  %2211 = vmatprep.subr.bf16.mxu0 %v2210_v40 }
 0x17a   : > { %2232 = vmatprep.subr.bf16.mxu1 %v2210_v40 }
 0x17c   : > { %2213 = vmatpush3.bf16.msra.mxu0 %v2212_v45 }
 0x17d   : > { %2240 = vmatpush3.bf16.msra.mxu1 %v2212_v45  ;;  %2215 = vmatprep.subr.bf16.mxu0 %v2214_v55 }
 0x17e   : > { %2233 = vmatprep.subr.bf16.mxu1 %v2214_v55 }
 0x180   : > { %2217 = vmatpush3.bf16.msra.mxu0 %v2216_v60 }
 0x181   : > { %2241 = vmatpush3.bf16.msra.mxu1 %v2216_v60 }
 0x1b5   : > { %v512_v17 = vpop.f32.mrb[0].mxu1 }
 0x1b6   : > { %v601_v20 = vpop.f32.mrb[0].mxu0  ;;  %v514_v21 = vpop.f32.mrb[1].mxu1 }
 0x1b7   : > { %v2945_v22 = vadd.f32 %v601_v20, %v512_v17  ;;  %v603_v23 = vpop.f32.mrb[1].mxu0  ;;  %v1062_v20 = vadd.s32 8, %v2949_v28 }
 0x1b8   : > { %v2947_v27 = vadd.f32 %v603_v23, %v514_v21  ;;  %v1083_v21 = vand.u32 15, %v1063_v13 }
 0x1b9   : > { %v518_v26 = vpop.f32.mrb[2].mxu1  ;;  %v1117_v42 = vrot.slane %v2945_v22, 7 }
 0x1ba   : > { %v607_v32 = vpop.f32.mrb[2].mxu0  ;;  %v520_v33 = vpop.f32.mrb[3].mxu1  ;;  %v1118_v46 = vrot.slane %v2947_v27, 7  ;;  %vm2986_vm3 = vcmp.eq.s32.totalorder %v1083_v21, 0 }
 0x1bb   : > { %v608_v34 = vadd.f32 %v607_v32, %v518_v26  ;;  %v609_v36 = vpop.f32.mrb[3].mxu0  ;;  %v1064_v26 = vadd.s32 24, %v2949_v28 }
 0x1bc   : > { %v610_v39 = vadd.f32 %v609_v36, %v520_v33  ;;  %v1076_v36 = vand.u32 15, %v1062_v20 }
 0x1bd   : > { %v1119_v43 = vrot.slane %v608_v34, 7  ;;  %v524_v44 = vpop.f32.mrb[4].mxu1 }
 0x1be   : > { %v1120_v47 = vrot.slane %v610_v39, 7  ;;  %v613_v16 = vpop.f32.mrb[4].mxu0  ;;  %v526_v48 = vpop.f32.mrb[5].mxu1  ;;  %v2991_v39 = vrot.slane %v1357_v29, %v1361_v25  ;;  %vm2997_vm4 = vcmp.eq.s32.totalorder %v1076_v36, 15 }
 0x1bf   : > { %v614_v49 = vadd.f32 %v613_v16, %v524_v44  ;;  %v615_v50 = vpop.f32.mrb[5].mxu0  ;;  %v1130_v51 = vsel %vm1125_vm0, %v1117_v42, %v1119_v43  ;;  %v1366_v44 = vrot.slane %v1357_v29, %v1365_v18  ;;  %v1090_v16 = vand.u32 15, %v1064_v26 }
 0x1c0   : > { %v616_v53 = vadd.f32 %v615_v50, %v526_v48  ;;  %v1131_v54 = vsel %vm1125_vm0, %v1118_v46, %v1120_v47 }
 0x1c1   : > { %v1121_v58 = vrot.slane %v614_v49, 7  ;;  %v530_v59 = vpop.f32.mrb[6].mxu1  ;;  %vm3012_vm5 = vcmp.eq.s32.totalorder %v1090_v16, 15 }
 0x1c2   : > { %v1122_v61 = vrot.slane %v616_v53, 7  ;;  %v619_v62 = vpop.f32.mrb[6].mxu0  ;;  %v532_v63 = vpop.f32.mrb[7].mxu1 }
 0x1c3   : > { %v620_v0 = vadd.f32 %v619_v62, %v530_v59  ;;  %v621_v19 = vpop.f32.mrb[7].mxu0  ;;  %v1128_v1 = vsel %vm1125_vm0, %v1119_v43, %v1121_v58 }
 0x1c4   : > { %v622_v3 = vadd.f32 %v621_v19, %v532_v63  ;;  %v1129_v4 = vsel %vm1125_vm0, %v1120_v47, %v1122_v61 }
 0x1c5   : > { %v1123_v5 = vrot.slane %v620_v0, 7  ;;  %v1139_v56 = vsel %vm2986_vm3, 0.0, %v1129_v4 }
 0x1c6   : > { %v1124_v6 = vrot.slane %v622_v3, 7 }
 0x1c7   : > { %v1132_v7 = vsel %vm1125_vm0, %v1123_v5, %v1117_v42  ;;  %v2966_v8 = vsel %vm1125_vm0, %v1121_v58, %v1123_v5 }
 0x1c8   : > { %v1133_v10 = vsel %vm1125_vm0, %v1124_v6, %v1118_v46  ;;  %v2972_v11 = vsel %vm1125_vm0, %v1122_v61, %v1124_v6  ;;  %v1134_v15 = vsel %vm1113_vm1, 0.0, %v1132_v7 }
 0x1c9   : > { %v1135_v23 = vsel %vm1113_vm1, 0.0, %v1133_v10 }
 0x235   : > { %v2976_v14 = vpop.f32.mrb[8].mxu1 }
 0x236   : > { %v1297_v17 = vpop.f32.mrb[8].mxu0  ;;  %v2978_v9 = vpop.f32.mrb[9].mxu1  ;;  %v1324_v31 = vrot.slane %v2976_v14, 1 }
 0x237   : > { %v2250_v22 = vadd.f32 %v1297_v17, %v1134_v15  ;;  %v1299_v24 = vpop.f32.mrb[9].mxu0  ;;  %v1325_v38 = vrot.slane %v2978_v9, 1 }
 0x238   : > { %v2251_v27 = vadd.f32 %v1299_v24, %v1135_v23 }
 0x239   : > { %v1043_v30 = vpop.f32.mrb[10].mxu1 }
 0x23a   : > { %v1326_v32 = vrot.slane %v1043_v30, 1  ;;  %v1303_v33 = vpop.f32.mrb[10].mxu0  ;;  %v1045_v34 = vpop.f32.mrb[11].mxu1 }
 0x23b   : > { %v2252_v40 = vadd.f32 %v1303_v33, %v1130_v51  ;;  %v1327_v35 = vrot.slane %v1045_v34, 1  ;;  %v1305_v41 = vpop.f32.mrb[11].mxu0  ;;  %v1138_v51 = vsel %vm2986_vm3, 0.0, %v1128_v1 }
 0x23c   : > { %v1337_v42 = vsel %vm1332_vm2, %v1324_v31, %v1326_v32  ;;  %v2253_v43 = vadd.f32 %v1305_v41, %v1131_v54 }
 0x23d   : > { %v1349_v45 = vadd.f32 %v2250_v22, %v1337_v42  ;;  %v1338_v46 = vsel %vm1332_vm2, %v1325_v38, %v1327_v35  ;;  %v1049_v47 = vpop.f32.mrb[12].mxu1 }
 0x23e   : > { %v1350_v48 = vadd.f32 %v2251_v27, %v1338_v46  ;;  %v1328_v50 = vrot.slane %v1049_v47, 1  ;;  %v1309_v52 = vpop.f32.mrb[12].mxu0  ;;  %v1051_v2 = vpop.f32.mrb[13].mxu1 }
 0x23f   : > { %v1369_v53 = vadd.f32 %v2991_v39, %v1349_v45  ;;  %v2254_v54 = vadd.f32 %v1309_v52, %v1138_v51  ;;  %v1329_v55 = vrot.slane %v1051_v2, 1  ;;  %v1311_v57 = vpop.f32.mrb[13].mxu0  ;;  %v1503_v51 = vld [vmem:[#allocation10 + $0x8] sm:$0xff] }
 0x240   : > { %v1335_v58 = vsel %vm1332_vm2, %v1326_v32, %v1328_v50  ;;  %v2255_v59 = vadd.f32 %v1311_v57, %v1139_v56  ;;  %v1370_v60 = vadd.f32 %v1366_v44, %v1350_v48 }
 0x241   : > { %v1343_v61 = vsel %vm2997_vm4, 0.0, %v1335_v58  ;;  %v1336_v62 = vsel %vm1332_vm2, %v1327_v35, %v1329_v55  ;;  %v1055_v63 = vpop.f32.mrb[14].mxu1  ;;  %v1377_v7 = vmax.f32 %v1369_v53, 0.0 }
 0x242   : > { %v1344_v19 = vsel %vm2997_vm4, 0.0, %v1336_v62  ;;  %v1330_v1 = vrot.slane %v1055_v63, 1  ;;  %v1315_v3 = vpop.f32.mrb[14].mxu0  ;;  %v1057_v4 = vpop.f32.mrb[15].mxu1  ;;  %v1378_v5 = vmax.f32 %v1370_v60, 0.0  ;;  %v1351_v6 = vadd.f32 %v2252_v40, %v1343_v61 }
 0x243   : > { %v2256_v10 = vadd.f32 %v1315_v3, %v2966_v8  ;;  %v1331_v12 = vrot.slane %v1057_v4, 1  ;;  %v1317_v13 = vpop.f32.mrb[15].mxu0  ;;  %v1352_v14 = vadd.f32 %v2253_v43, %v1344_v19 }
 0x244   : > { %v1333_v15 = vsel %vm1332_vm2, %v1328_v50, %v1330_v1  ;;  %v1339_v17 = vsel %vm1332_vm2, %v1330_v1, %v1324_v31  ;;  %v2257_v9 = vadd.f32 %v1317_v13, %v2972_v11  ;;  %1481 = vmatprep.mubr.f32.mxu0 %v1378_v5  ;;  %v1371_v20 = vadd.f32 %v2991_v39, %v1351_v6 }
 0x245   : > { %v1353_v21 = vadd.f32 %v2254_v54, %v1333_v15  ;;  %v1347_v22 = vsel %vm3012_vm5, 0.0, %v1339_v17  ;;  %v1334_v8 = vsel %vm1332_vm2, %v1329_v55, %v1331_v12  ;;  %v1340_v23 = vsel %vm1332_vm2, %v1331_v12, %v1325_v38  ;;  %1482 = vmatmul.mubr.f32.vlgmr.msra.gmra.mrb[16].mxu0 %v1377_v7  ;;  %v1502_v38 = vld [vmem:[#allocation10] sm:$0xff] }
 0x246   : > { %v1355_v24 = vadd.f32 %v2256_v10, %v1347_v22  ;;  %v1354_v25 = vadd.f32 %v2255_v59, %v1334_v8  ;;  %v1348_v27 = vsel %vm3012_vm5, 0.0, %v1340_v23  ;;  %v1372_v11 = vadd.f32 %v1366_v44, %v1352_v14 }
 0x247   : > { %v1373_v29 = vadd.f32 %v2991_v39, %v1353_v21  ;;  %v1356_v18 = vadd.f32 %v2257_v9, %v1348_v27  ;;  %v1379_v31 = vmax.f32 %v1371_v20, 0.0 }
 0x248   : > { %v1380_v30 = vmax.f32 %v1372_v11, 0.0  ;;  %v1374_v26 = vadd.f32 %v1366_v44, %v1354_v25  ;;  %v1375_v36 = vadd.f32 %v2991_v39, %v1355_v24 }
 0x249   : > { %v1376_v32 = vadd.f32 %v1366_v44, %v1356_v18  ;;  %v1381_v34 = vmax.f32 %v1373_v29, 0.0 }
 0x24a   : > { %1486 = vmatprep.mubr.f32.mxu0 %v1380_v30  ;;  %v1382_v33 = vmax.f32 %v1374_v26, 0.0  ;;  %v1383_v37 = vmax.f32 %v1375_v36, 0.0 }
 0x24b   : > { %1487 = vmatmul.mubr.f32.gmra.mrb[18].mxu0 %v1379_v31  ;;  %v1384_v28 = vmax.f32 %v1376_v32, 0.0 }
 0x24c   : > { %1491 = vmatprep.mubr.f32.mxu1 %v1382_v33 }
 0x24d   : > { %1492 = vmatmul.mubr.f32.vlgmr.msra.gmra.mrb[16].mxu1 %v1381_v34 }
 0x24e   : > { %1496 = vmatprep.mubr.f32.mxu1 %v1384_v28 }
 0x251   : > { %1497 = vmatmul.mubr.f32.gmra.mrb[18].mxu1 %v1383_v37 }
 0x252   : > { %1799 = vmatprep.mubr.msk.f32.mxu1 %vm1504_vm6, %v1502_v38 }
 0x318   : > { %v1773_v40 = vpop.f32.mrb[16].mxu0 }
 0x319   : > { %v1774_v35 = vpop.f32.mrb[17].mxu0 }
 0x31a   : > { %v1775_v41 = vadd.f32 %v1774_v35, %v1773_v40 }
 0x31e   : > { %v1776_v42 = vpop.f32.mrb[18].mxu0 }
 0x31f   : > { %v1777_v43 = vpop.f32.mrb[19].mxu0 }
 0x320   : > { %v1778_v44 = vadd.f32 %v1777_v43, %v1776_v42  ;;  %v1779_v45 = vpop.f32.mrb[16].mxu1 }
 0x321   : > { %v1780_v46 = vpop.f32.mrb[17].mxu1 }
 0x322   : > { %v2218_v39 = vpack.c.bf16 %v1778_v44, %v1775_v41  ;;  %v1781_v47 = vadd.f32 %v1780_v46, %v1779_v45 }
 0x324   : > { %2219 = vmatprep.subr.bf16.mxu1 %v2218_v39  ;;  %v1782_v16 = vpop.f32.mrb[18].mxu1 }
 0x325   : > { %2221 = vmatpush3.bf16.msra.mxu1 %v2218_v39  ;;  %v1783_v48 = vpop.f32.mrb[19].mxu1 }
 0x326   : > { %v1784_v49 = vadd.f32 %v1783_v48, %v1782_v16 }
 0x328   : > { %v2222_v50 = vpack.c.bf16 %v1784_v49, %v1781_v47 }
 0x32a   : > { %2223 = vmatprep.subr.bf16.mxu1 %v2222_v50 }
 0x32b   : > { %2225 = vmatpush3.bf16.msra.mxu1 %v2222_v50 }
 0x32e   : > { %1800 = vmatmul.mubr.msk.f32.vlgmr.msra.gmra.mrb[20].mxu1 %vm1504_vm6, %v1503_v51 }
 0x401   : > { %v1801_v52 = vpop.f32.mrb[20].mxu1 }
 0x402   : > { %1587 = vst [vmem:[%s299_s26 + $0x8] sm:$0xff] %v1801_v52  ;;  %v1577_v2 = vpop.f32.mrb[21].mxu1 }
 0x403   : > { %1586 = vst [vmem:[%s299_s26] sm:$0xff] %v1577_v2 }
 0x404   : > { %2531 = shalt.err (!%p2528_p13)
}
 0x405   : > { %s2532_s16 = scalar_lea.hbm %s3044_s8, 256  ;;  %s2536_s14 = scalar_lea.hbm %s3093_s5, 512 }
 0x406   : > { %p2533_p9 = scmp.ne.s32.totalorder %s3044_s8, %s2532_s16  ;;  %p2537_p6 = scmp.lt.u32.totalorder %s3044_s8, %s3093_s5 }
 0x407   : > { %p2538_p10 = scmp.lt.u32.totalorder %s2536_s14, %s2532_s16  ;;  %p2540_p4 = scmp.lt.u32.totalorder %s2532_s16, %s3044_s8 }
 0x408   : > { %p2534_p0 = pnand %p2533_p9, %p2810_p8 }
 0x409   : > { %p2539_p3 = por %p2538_p10, %p2537_p6 }
 0x40a   : > { %p2535_p11 = pneg %p2534_p0 }
 0x40b   : > { %p2541_p5 = por %p2540_p4, %p2539_p3 }
 0x40d   : > { %p2542_p7 = pnand %p2541_p5, %p2535_p11 }
 0x40f   : > { %2545 = shalt.err (!%p2542_p7)
}
 0x410   : > { %s2606_s13 = smov 128   ;;  %s2607_s28 = smov 8  }
 0x411   : > { %2292 = dma.vmem_to_hbm [thread:$0]  (%p2810_p8), %s3039_s10, 256, %s3044_s8, %s1589_s15, %s2606_s13, %s2606_s13, %s2607_s28  }
 0x412 PF: > { %s1617_s27 = sand.u32 1, %s2580_s18   ;;  %p3117_p12 = scmp.ne.s32.totalorder %s3098_s25, 0 }
 0x413   : > { %p3118_p2 = scmp.ge.s32.totalorder %s2592_s21, 2  ;;  %s1618_s7 = scalar_lea.sflag [#allocation4], %s1617_s27 }
 0x415   : > { %p2312_p1 = pnand %p3118_p2, %p3117_p12 }
 0x417   : > { %2575 = dma.done.wait (!%p2312_p1), %s1618_s7, 256  }
 0x418   : > { %2577 = vsyncadd (!%p2312_p1), %s1618_s7, 4294967040  ;;  %p20_p13 = scmp.ge.s32.totalorder %s2797_s29, 4   ;;  %s3119_s18 = smov %s2584_s19 }
 0x419   : > { %s3120_s19 = smov %s2588_s20  ;;  %s3121_s20 = smov %s2806_s23 }
 0x41a   : > { %s3122_s21 = smov %s2797_s29  ;;  %22 = sbr.rel (!%p20_p13) target bundleno = 7 (0x7), region = 103 }
 0x421   :  { %1623 = vsyncpa [#allocation3], 1 }
 0x422   :  { %1625 = vsyncpa [#allocation3 + $0x1], 1 }
 0x423   :  { %1626 = vsyncpa [#allocation6], 1 }
 0x424   :  { %1627 = vsyncpa [#allocation9], 1 }
 0x425   :  { %1628 = vsyncpa [#allocation4], 1 }
 0x426   :  { %1630 = vsyncpa [#allocation4 + $0x1], 1 }

</bundles_post_ra>
